<compile_context>
chip_gen: v5e
topology: v5e:2x2
jax: 0.10.0
libtpu: 0.0.40
codegen_flags: <defaults>
</compile_context>

<pallas_src>
import functools

import jax
import jax.numpy as jnp
from jax import lax
from jax.experimental import pallas as pl
from jax.experimental.pallas import tpu as pltpu


def _round_up(x: int, m: int) -> int:
    return ((x + m - 1) // m) * m


def _pad2d(a, rows: int, cols: int):
    r, c = a.shape
    if r == rows and c == cols:
        return a
    return jnp.pad(a, ((0, rows - r), (0, cols - c)))


def _sn_linear_kernel(x_ref, wt_ref, b_ref, u_ref,
                      y_ref, u_out_ref, v_out_ref,
                      inv_sigma_ref,
                      *, power_iterations: int, eps: float):
    # x_ref : (TILE_B, Kp) f32   input rows
    # wt_ref: (Kp, Np)    bf16   W^T  (W = weight_bar, shape (N, K))
    # b_ref : (1, Np)     f32    bias
    # u_ref : (1, Np)     f32    left singular-vector estimate
    # y_ref : (TILE_B, Np) f32   output
    # inv_sigma_ref : VMEM (1,1) f32 scratch, persists across batch tiles.

    @pl.when(pl.program_id(0) == 0)
    def _power_iteration():
        wt = wt_ref[...]                                   # (Kp, Np) bf16
        u = u_ref[...].astype(jnp.float32)                 # (1, Np)  f32
        v = None
        u_un = None
        for _ in range(power_iterations):
            # v = l2normalize(W^T u).  Row form: contract u's N axis with the
            # N (lane) axis of W^T -> (1, Kp).  Same transposed-rhs matmul form
            # as flash attention's q @ k^T; no full-weight XLU transpose.
            v_un = lax.dot_general(u.astype(jnp.bfloat16), wt,
                                   (((1,), (1,)), ((), ())),
                                   preferred_element_type=jnp.float32)
            v_ss = jnp.sum(v_un * v_un, axis=-1, keepdims=True)        # (1, 1)
            v = v_un / (jnp.sqrt(v_ss) + eps)
            # u = l2normalize(W v):  (1, Kp) @ (Kp, Np) -> (1, Np), canonical.
            u_un = jnp.dot(v.astype(jnp.bfloat16), wt,
                           preferred_element_type=jnp.float32)
            u_ss = jnp.sum(u_un * u_un, axis=-1, keepdims=True)        # (1, 1)
            u = u_un / (jnp.sqrt(u_ss) + eps)

        # sigma = u . (W v);  W v == u_un from the last iteration.
        sigma = jnp.sum(u * u_un, axis=-1, keepdims=True)              # (1, 1)
        inv_sigma_ref[...] = pl.reciprocal(sigma, approx=True)

        # Written once (tile 0); output blocks are resident across the grid.
        u_out_ref[...] = u.astype(u_out_ref.dtype)
        v_out_ref[...] = v.astype(v_out_ref.dtype)

    # y = x @ (W / sigma)^T + b  ==  (x @ W^T) * (1/sigma) + b
    y = jnp.dot(x_ref[...].astype(jnp.bfloat16), wt_ref[...],
                preferred_element_type=jnp.float32)                    # (TILE_B, Np)
    y_ref[...] = (y * inv_sigma_ref[...] + b_ref[...]).astype(y_ref.dtype)


def prepare_spectral_norm_linear_params(w_bar, b, u, *, compute_dtype=jnp.bfloat16):
    """One-time (parameter-load-time) preprocessing.

    Hoists the transpose + lane/sublane padding + bf16 cast of the weight out
    of the per-forward path, so each forward reads only the already-prepared
    (Kp, Np) bf16 W^T from HBM.
    """
    N, K = w_bar.shape
    Kp = _round_up(K, 128)
    Np = _round_up(N, 128)
    wt_p = _pad2d(jnp.transpose(w_bar), Kp, Np).astype(compute_dtype)   # (Kp, Np)
    b_p = _pad2d(b.reshape(1, N).astype(jnp.float32), 1, Np)            # (1, Np)
    u_p = _pad2d(u.reshape(1, N).astype(jnp.float32), 1, Np)            # (1, Np)
    return wt_p, b_p, u_p


@functools.partial(jax.jit,
                   static_argnames=("n_out", "k_in", "power_iterations", "eps"))
def _sn_linear_apply(x, wt_p, b_p, u_p, *, n_out, k_in, power_iterations, eps):
    B, K = x.shape
    assert K == k_in, (K, k_in)
    Kp, Np = wt_p.shape

    B8 = _round_up(max(B, 1), 8)
    tile_b = min(256, B8)                       # fills the 256-wide MXU on v6e/v7x
    Bp = _round_up(B8, tile_b)
    n_tiles = Bp // tile_b

    x_p = _pad2d(x, Bp, Kp)

    # VMEM budget from actual buffer sizes (double-buffered x/y tiles, weight,
    # small vectors), capped below v7x's 64 MiB physical VMEM.
    need = (2 * Kp * Np * wt_p.dtype.itemsize          # W^T (assume 2 bufs)
            + 2 * tile_b * Kp * 4                      # x tiles
            + 2 * tile_b * Np * 4                      # y tiles
            + (2 << 20))                               # bias/u/u_out/v_out/slack
    vmem_limit = int(min(max(need + (8 << 20), 32 << 20), 48 << 20))

    y_p, u_new_p, v_new_p = pl.pallas_call(
        functools.partial(_sn_linear_kernel,
                          power_iterations=power_iterations, eps=eps),
        out_shape=(
            jax.ShapeDtypeStruct((Bp, Np), x.dtype),
            jax.ShapeDtypeStruct((1, Np), jnp.float32),
            jax.ShapeDtypeStruct((1, Kp), jnp.float32),
        ),
        grid=(n_tiles,),
        in_specs=[
            pl.BlockSpec((tile_b, Kp), lambda i: (i, 0)),   # x tile (pipelined)
            pl.BlockSpec((Kp, Np), lambda i: (0, 0)),       # W^T (resident)
            pl.BlockSpec((1, Np), lambda i: (0, 0)),        # bias (resident)
            pl.BlockSpec((1, Np), lambda i: (0, 0)),        # u    (resident)
        ],
        out_specs=(
            pl.BlockSpec((tile_b, Np), lambda i: (i, 0)),   # y tile
            pl.BlockSpec((1, Np), lambda i: (0, 0)),        # u_new (resident)
            pl.BlockSpec((1, Kp), lambda i: (0, 0)),        # v_new (resident)
        ),
        scratch_shapes=[pltpu.VMEM((1, 1), jnp.float32)],   # inv_sigma carry
        compiler_params=pltpu.CompilerParams(
            # Resident (constant-index) u/v outputs and the inv_sigma scratch
            # carried from tile 0 require sequential grid execution.
            dimension_semantics=("arbitrary",),
            vmem_limit_bytes=vmem_limit,
        ),
    )(x_p, wt_p, b_p, u_p)

    y = y_p[:B, :n_out]
    u_new = u_new_p[0, :n_out]
    v_new = v_new_p[0, :k_in]
    return y, u_new, v_new


def spectral_norm_linear(x, w_bar, b, u, v=None, *, power_iterations=1, eps=1e-12):
    """SpectralNorm(nn.Linear).forward.

    x:     (B, K)   flattened input
    w_bar: (N, K)   weight_bar  (N = out_features, K = in_features)
    b:     (N,)     bias
    u:     (N,)     left singular-vector buffer
    v:     (K,)     right singular-vector buffer (overwritten before first read
                    when power_iterations >= 1, exactly like the PyTorch code)
    Returns (y, u_new, v_new).
    """
    assert power_iterations >= 1, "power_iterations must be >= 1"
    del v  # overwritten before first read for power_iterations >= 1
    N, K = w_bar.shape
    # NOTE: in a real model, call prepare_* once at parameter-load time and
    # reuse wt_p/b_p/u_p across forwards; done inline here for a self-contained demo.
    wt_p, b_p, u_p = prepare_spectral_norm_linear_params(w_bar, b, u)
    return _sn_linear_apply(x, wt_p, b_p, u_p, n_out=N, k_in=K,
                            power_iterations=power_iterations, eps=eps)


def _spectral_norm_linear_ref(x, w_bar, b, u, *, power_iterations=1, eps=1e-12):
    """Pure-JAX reference mirroring the PyTorch SpectralNorm + F.linear."""
    w = w_bar
    v = None
    for _ in range(power_iterations):
        v = w.T @ u
        v = v / (jnp.linalg.norm(v) + eps)
        u_un = w @ v
        u = u_un / (jnp.linalg.norm(u_un) + eps)
    sigma = u @ (w @ v)
    w_sn = w / sigma
    y = x @ w_sn.T + b
    return y, u, v


def _rel_err(a, b):
    return float(jnp.linalg.norm(a - b) / (jnp.linalg.norm(b) + 1e-12))


if __name__ == "__main__":
    key = jax.random.PRNGKey(0)
    kx, kw, kb, ku, kv = jax.random.split(key, 5)

    # Small shapes: NCHW input flattened to (B, C*H*W) feeding the wrapped Linear.
    B, C, H, W = 2, 4, 16, 16
    in_features = C * H * W          # 1024
    out_features = 256

    x_img = jax.random.normal(kx, (B, C, H, W), jnp.float32)
    x = x_img.reshape(B, -1)

    # nn.Linear default init for weight_bar / bias.
    bound = 1.0 / (in_features ** 0.5)
    w_bar = jax.random.uniform(kw, (out_features, in_features), jnp.float32,
                               -bound, bound)
    b = jax.random.uniform(kb, (out_features,), jnp.float32, -bound, bound)

    # u, v buffers: N(0,1) then l2-normalized (as in _make_params).
    u0 = jax.random.normal(ku, (out_features,), jnp.float32)
    u0 = u0 / (jnp.linalg.norm(u0) + 1e-12)
    v0 = jax.random.normal(kv, (in_features,), jnp.float32)
    v0 = v0 / (jnp.linalg.norm(v0) + 1e-12)

    y, u_new, v_new = spectral_norm_linear(x, w_bar, b, u0, v0,
                                           power_iterations=1, eps=1e-12)
    y, u_new, v_new = jax.block_until_ready((y, u_new, v_new))

    # Correctness check against the pure-JAX reference (bf16 MXU path -> 2e-2 tol).
    y_ref, u_ref, v_ref = _spectral_norm_linear_ref(x, w_bar, b, u0,
                                                    power_iterations=1, eps=1e-12)
    assert y.shape == (B, out_features), y.shape
    assert u_new.shape == (out_features,) and v_new.shape == (in_features,)
    assert _rel_err(y, y_ref) < 2e-2, _rel_err(y, y_ref)
    assert _rel_err(u_new, u_ref) < 2e-2, _rel_err(u_new, u_ref)
    assert _rel_err(v_new, v_ref) < 2e-2, _rel_err(v_new, v_ref)

    print("KERNEL_OK")
</pallas_src>

<mosaic_0001>
module attributes {stable_mosaic.version = 11 : i64} {
  func.func @_sn_linear_kernel(%arg0: i32, %arg1: memref<8x1024xf32, #tpu.memory_space<vmem>>, %arg2: memref<1024x256xbf16, #tpu.memory_space<vmem>>, %arg3: memref<1x256xf32, #tpu.memory_space<vmem>>, %arg4: memref<1x256xf32, #tpu.memory_space<vmem>>, %arg5: memref<8x256xf32, #tpu.memory_space<vmem>>, %arg6: memref<1x256xf32, #tpu.memory_space<vmem>>, %arg7: memref<1x1024xf32, #tpu.memory_space<vmem>>, %arg8: memref<1x1xf32, #tpu.memory_space<vmem>>) attributes {dimension_semantics = [#tpu.dimension_semantics<arbitrary>], iteration_bounds = array<i64: 1>, scalar_prefetch = 0 : i64, scratch_operands = 1 : i64, tpu.core_type = #tpu.core_type<tc>, window_params = [{transform_indices = @transform_0, window_bounds = array<i64: 8, 1024>}, {pipeline_mode = #tpu.pipeline_mode<synchronous>, transform_indices = @transform_1, window_bounds = array<i64: 1024, 256>}, {pipeline_mode = #tpu.pipeline_mode<synchronous>, transform_indices = @transform_2, window_bounds = array<i64: 1, 256>}, {pipeline_mode = #tpu.pipeline_mode<synchronous>, transform_indices = @transform_3, window_bounds = array<i64: 1, 256>}, {transform_indices = @transform_4, window_bounds = array<i64: 8, 256>}, {pipeline_mode = #tpu.pipeline_mode<synchronous>, transform_indices = @transform_5, window_bounds = array<i64: 1, 256>}, {pipeline_mode = #tpu.pipeline_mode<synchronous>, transform_indices = @transform_6, window_bounds = array<i64: 1, 1024>}]} {
    %c0_i32 = arith.constant 0 : i32
    %0 = arith.cmpi eq, %arg0, %c0_i32 : i32
    %1 = arith.extui %0 : i1 to i32
    %c0_i32_0 = arith.constant 0 : i32
    %2 = arith.cmpi ne, %1, %c0_i32_0 : i32
    scf.if %2 {
      %c0_10 = arith.constant 0 : index
      %c0_11 = arith.constant 0 : index
      %14 = vector.load %arg2[%c0_10, %c0_11] : memref<1024x256xbf16, #tpu.memory_space<vmem>>, vector<1024x256xbf16>
      %c0_12 = arith.constant 0 : index
      %c0_13 = arith.constant 0 : index
      %15 = vector.load %arg4[%c0_12, %c0_13] : memref<1x256xf32, #tpu.memory_space<vmem>>, vector<1x256xf32>
      %16 = arith.truncf %15 : vector<1x256xf32> to vector<1x256xbf16>
      %cst_14 = arith.constant dense<0.000000e+00> : vector<1x1024xf32>
      %17 = tpu.matmul %16, %14, %cst_14 {dimension_numbers = #tpu.dot_dimension_numbers<[1], [1], [0], [0], [0, 0, 1, 0], [], []>} : vector<1x256xbf16>, vector<1024x256xbf16>, vector<1x1024xf32> -> vector<1x1024xf32>
      %18 = arith.mulf %17, %17 : vector<1x1024xf32>
      %cst_15 = arith.constant dense<0.000000e+00> : vector<1xf32>
      %19 = vector.multi_reduction <add>, %18, %cst_15 [1] : vector<1x1024xf32> to vector<1xf32>
      %20 = vector.shape_cast %19 : vector<1xf32> to vector<1x1xf32>
      %21 = math.sqrt %20 : vector<1x1xf32>
      %cst_16 = arith.constant 9.99999996E-13 : f32
      %22 = vector.broadcast %cst_16 : f32 to vector<1x1xf32>
      %23 = arith.addf %21, %22 : vector<1x1xf32>
      %24 = vector.broadcast %23 : vector<1x1xf32> to vector<1x1024xf32>
      %25 = arith.divf %17, %24 : vector<1x1024xf32>
      %26 = arith.truncf %25 : vector<1x1024xf32> to vector<1x1024xbf16>
      %cst_17 = arith.constant dense<0.000000e+00> : vector<1x256xf32>
      %27 = tpu.matmul %26, %14, %cst_17 {dimension_numbers = #tpu.dot_dimension_numbers<[1], [0], [0], [1], [0, 0, 1, 1], [], []>} : vector<1x1024xbf16>, vector<1024x256xbf16>, vector<1x256xf32> -> vector<1x256xf32>
      %28 = arith.mulf %27, %27 : vector<1x256xf32>
      %cst_18 = arith.constant dense<0.000000e+00> : vector<1xf32>
      %29 = vector.multi_reduction <add>, %28, %cst_18 [1] : vector<1x256xf32> to vector<1xf32>
      %30 = vector.shape_cast %29 : vector<1xf32> to vector<1x1xf32>
      %31 = math.sqrt %30 : vector<1x1xf32>
      %cst_19 = arith.constant 9.99999996E-13 : f32
      %32 = vector.broadcast %cst_19 : f32 to vector<1x1xf32>
      %33 = arith.addf %31, %32 : vector<1x1xf32>
      %34 = vector.broadcast %33 : vector<1x1xf32> to vector<1x256xf32>
      %35 = arith.divf %27, %34 : vector<1x256xf32>
      %36 = arith.mulf %35, %27 : vector<1x256xf32>
      %cst_20 = arith.constant dense<0.000000e+00> : vector<1xf32>
      %37 = vector.multi_reduction <add>, %36, %cst_20 [1] : vector<1x256xf32> to vector<1xf32>
      %38 = vector.shape_cast %37 : vector<1xf32> to vector<1x1xf32>
      %39 = tpu.reciprocal %38 {approx = true} : vector<1x1xf32> -> vector<1x1xf32>
      %c0_21 = arith.constant 0 : index
      %c0_22 = arith.constant 0 : index
      %40 = vector.load %arg8[%c0_21, %c0_22] : memref<1x1xf32, #tpu.memory_space<vmem>>, vector<1x1xf32>
      tpu.vector_store %arg8[%c0_21, %c0_22], %39 {strides = array<i32>} : memref<1x1xf32, #tpu.memory_space<vmem>>, vector<1x1xf32>,
      %c0_23 = arith.constant 0 : index
      %c0_24 = arith.constant 0 : index
      %41 = vector.load %arg6[%c0_23, %c0_24] : memref<1x256xf32, #tpu.memory_space<vmem>>, vector<1x256xf32>
      tpu.vector_store %arg6[%c0_23, %c0_24], %35 {strides = array<i32>} : memref<1x256xf32, #tpu.memory_space<vmem>>, vector<1x256xf32>,
      %c0_25 = arith.constant 0 : index
      %c0_26 = arith.constant 0 : index
      %42 = vector.load %arg7[%c0_25, %c0_26] : memref<1x1024xf32, #tpu.memory_space<vmem>>, vector<1x1024xf32>
      tpu.vector_store %arg7[%c0_25, %c0_26], %25 {strides = array<i32>} : memref<1x1024xf32, #tpu.memory_space<vmem>>, vector<1x1024xf32>,
    } else {
    }
    %c0 = arith.constant 0 : index
    %c0_1 = arith.constant 0 : index
    %3 = vector.load %arg1[%c0, %c0_1] : memref<8x1024xf32, #tpu.memory_space<vmem>>, vector<8x1024xf32>
    %4 = arith.truncf %3 : vector<8x1024xf32> to vector<8x1024xbf16>
    %c0_2 = arith.constant 0 : index
    %c0_3 = arith.constant 0 : index
    %5 = vector.load %arg2[%c0_2, %c0_3] : memref<1024x256xbf16, #tpu.memory_space<vmem>>, vector<1024x256xbf16>
    %cst = arith.constant dense<0.000000e+00> : vector<8x256xf32>
    %6 = tpu.matmul %4, %5, %cst {dimension_numbers = #tpu.dot_dimension_numbers<[1], [0], [0], [1], [0, 0, 1, 1], [], []>} : vector<8x1024xbf16>, vector<1024x256xbf16>, vector<8x256xf32> -> vector<8x256xf32>
    %c0_4 = arith.constant 0 : index
    %c0_5 = arith.constant 0 : index
    %7 = vector.load %arg8[%c0_4, %c0_5] : memref<1x1xf32, #tpu.memory_space<vmem>>, vector<1x1xf32>
    %8 = vector.broadcast %7 : vector<1x1xf32> to vector<8x256xf32>
    %9 = arith.mulf %6, %8 : vector<8x256xf32>
    %c0_6 = arith.constant 0 : index
    %c0_7 = arith.constant 0 : index
    %10 = vector.load %arg3[%c0_6, %c0_7] : memref<1x256xf32, #tpu.memory_space<vmem>>, vector<1x256xf32>
    %11 = vector.broadcast %10 : vector<1x256xf32> to vector<8x256xf32>
    %12 = arith.addf %9, %11 : vector<8x256xf32>
    %c0_8 = arith.constant 0 : index
    %c0_9 = arith.constant 0 : index
    %13 = vector.load %arg5[%c0_8, %c0_9] : memref<8x256xf32, #tpu.memory_space<vmem>>, vector<8x256xf32>
    tpu.vector_store %arg5[%c0_8, %c0_9], %12 {strides = array<i32>} : memref<8x256xf32, #tpu.memory_space<vmem>>, vector<8x256xf32>,
    return
  }
  func.func @transform_0(%arg0: i32) -> (i32, i32) {
    %c0_i32 = arith.constant 0 : i32
    %c0_i32_0 = arith.constant 0 : i32
    return %arg0, %c0_i32 : i32, i32
  }
  func.func @transform_1(%arg0: i32) -> (i32, i32) {
    %c0_i32 = arith.constant 0 : i32
    %c0_i32_0 = arith.constant 0 : i32
    %c0_i32_1 = arith.constant 0 : i32
    return %c0_i32, %c0_i32_0 : i32, i32
  }
  func.func @transform_2(%arg0: i32) -> (i32, i32) {
    %c0_i32 = arith.constant 0 : i32
    %c0_i32_0 = arith.constant 0 : i32
    %c0_i32_1 = arith.constant 0 : i32
    return %c0_i32, %c0_i32_0 : i32, i32
  }
  func.func @transform_3(%arg0: i32) -> (i32, i32) {
    %c0_i32 = arith.constant 0 : i32
    %c0_i32_0 = arith.constant 0 : i32
    %c0_i32_1 = arith.constant 0 : i32
    return %c0_i32, %c0_i32_0 : i32, i32
  }
  func.func @transform_4(%arg0: i32) -> (i32, i32) {
    %c0_i32 = arith.constant 0 : i32
    %c0_i32_0 = arith.constant 0 : i32
    return %arg0, %c0_i32 : i32, i32
  }
  func.func @transform_5(%arg0: i32) -> (i32, i32) {
    %c0_i32 = arith.constant 0 : i32
    %c0_i32_0 = arith.constant 0 : i32
    %c0_i32_1 = arith.constant 0 : i32
    return %c0_i32, %c0_i32_0 : i32, i32
  }
  func.func @transform_6(%arg0: i32) -> (i32, i32) {
    %c0_i32 = arith.constant 0 : i32
    %c0_i32_0 = arith.constant 0 : i32
    %c0_i32_1 = arith.constant 0 : i32
    return %c0_i32, %c0_i32_0 : i32, i32
  }
}

</mosaic_0001>

<bundles_post_ra>
// kernel: _sn_linear_apply.1
= control target key start
LH: loop header
LB: loop body
LE: loop exit
PB: predicated region body
PF: predicated region fallthrough
CT: control target
= control target key end

     0   :  { %12 = vsyncpa [#allocation4], 0  ;;  %s4583_s0 = inlined_call_operand.vmem [shape: f32[8,1024], index: 0, kind: input, shape index: {}]   ;;  %s4584_s1 = inlined_call_operand.hbm [shape: bf16[1024,256], index: 1, kind: input, shape index: {}]   ;;  %s4585_s2 = inlined_call_operand.vmem [shape: f32[1,256], index: 2, kind: input, shape index: {}]   ;;  %s4586_s3 = inlined_call_operand.vmem [shape: f32[1,256], index: 3, kind: input, shape index: {}]   ;;  %s4587_s4 = inlined_call_operand.vmem [shape: f32[8,256], index: 4, kind: output, shape index: {0}]   ;;  %s4588_s5 = inlined_call_operand.hbm [shape: f32[1,256], index: 5, kind: output, shape index: {1}]   ;;  %s4589_s6 = inlined_call_operand.hbm [shape: f32[1,1024], index: 6, kind: output, shape index: {2}]  }
   0x1   :  { %13 = vsyncpa [#allocation5], 0 }
   0x2   :  { %14 = vsyncpa [#allocation8], 0  ;;  %s21_s23 = sshll.u32 %s4584_s1, 4  ;;  %s3814_s24 = smov [#allocation3]   ;;  %s22_s23 = int_to_ptr.hbm [resolvable:$true] %s21_s23 }
   0x3   :  { %s23_s25 = sshll.u32 %s3814_s24, 4  ;;  %s3815_s26 = smov 128   ;;  %s24_s25 = int_to_ptr.vmem [resolvable:$true] %s23_s25 }
   0x4   :  { %s3816_s27 = smov 8  }
   0x5   :  { %29 = dma.hbm_to_vmem [thread:$0]  %s22_s23, 16384, %s24_s25, [#allocation4], %s3815_s26, %s3815_s26, %s3816_s27  }
   0x6   :  { %3808 = dma.done.wait [#allocation4], 16384  }
   0x7   :  { %3809 = vsyncadd [#allocation4], 4294950912  ;;  %v2495_v0 = vld [vmem:[#allocation3 + $0x70] sm:$0xf]  ;;  %v3476_v1 = vld [vmem:[#allocation3 + $0x74] sm:$0xf0] }
   0x8   :  { %v3475_v2 = vld [vmem:[#allocation3 + $0x74] sm:$0xf]  ;;  %v3858_v3 = vor.u32 %v3476_v1, %v2495_v0  ;;  %v2497_v4 = vld [vmem:[#allocation3 + $0x78] sm:$0xf0]  ;;  %v2559_v5 = vld [vmem:[#allocation3 + $0xf0] sm:$0xf] }
   0x9   :  { %v3492_v6 = vld [vmem:[#allocation3 + $0xf4] sm:$0xf0]  ;;  %v3860_v7 = vor.u32 %v3475_v2, %v2497_v4  ;;  %v3491_v9 = vld [vmem:[#allocation3 + $0xf4] sm:$0xf]  ;;  %v2561_v10 = vld [vmem:[#allocation3 + $0xf8] sm:$0xf0] }
   0xa   :  { %v3862_v8 = vor.u32 %v3492_v6, %v2559_v5  ;;  %818 = vmatpush.bf16.xpose.msra.mxu0 %v3858_v3  ;;  %v3865_v11 = vor.u32 %v3491_v9, %v2561_v10  ;;  %v2487_v12 = vld [vmem:[#allocation3 + $0x60] sm:$0xf]  ;;  %v3474_v13 = vld [vmem:[#allocation3 + $0x64] sm:$0xf0]  ;;  %v3473_v14 = vld [vmem:[#allocation3 + $0x64] sm:$0xf] }
   0xb   :  { %4666 = vst [vmem:[#allocation12_spill] sm:$0xff] %v3860_v7  ;;  %831 = vmatpush.bf16.xpose.msra.mxu1 %v3860_v7  ;;  %v2489_v15 = vld [vmem:[#allocation3 + $0x68] sm:$0xf0]  ;;  %v2551_v16 = vld [vmem:[#allocation3 + $0xe0] sm:$0xf]  ;;  %v3870_v20 = vor.u32 %v3474_v13, %v2487_v12  ;;  %vm1034_vm0 = vcmask 1040384  }
   0xc   :  { %4667 = vst [vmem:[#allocation13_spill] sm:$0xff] %v3865_v11  ;;  %844 = vmatpush.bf16.xpose.msra.mxu2 %v3862_v8  ;;  %857 = vmatpush.bf16.xpose.msra.mxu3 %v3865_v11  ;;  %v3490_v17 = vld [vmem:[#allocation3 + $0xe4] sm:$0xf0]  ;;  %v3489_v18 = vld [vmem:[#allocation3 + $0xe4] sm:$0xf]  ;;  %v3872_v21 = vor.u32 %v3473_v14, %v2489_v15  ;;  %vm1375_vm7 = vcmask 1042434  }
   0xd   :  { %v2553_v19 = vld [vmem:[#allocation3 + $0xe8] sm:$0xf0]  ;;  %v3874_v22 = vor.u32 %v3490_v17, %v2551_v16  ;;  %v2479_v24 = vld [vmem:[#allocation3 + $0x50] sm:$0xf]  ;;  %v3472_v25 = vld [vmem:[#allocation3 + $0x54] sm:$0xf0] }
   0xe   :  { %4668 = vst [vmem:[#allocation14_spill] sm:$0xff] %v3872_v21  ;;  %v3876_v23 = vor.u32 %v3489_v18, %v2553_v19  ;;  %v3471_v26 = vld [vmem:[#allocation3 + $0x54] sm:$0xf]  ;;  %v2481_v27 = vld [vmem:[#allocation3 + $0x58] sm:$0xf0]  ;;  %v3882_v32 = vor.u32 %v3472_v25, %v2479_v24  ;;  %vm1379_vm8 = vcmask 1044484  }
   0xf   :  { %v2543_v28 = vld [vmem:[#allocation3 + $0xd0] sm:$0xf]  ;;  %v3488_v29 = vld [vmem:[#allocation3 + $0xd4] sm:$0xf0]  ;;  %v3487_v30 = vld [vmem:[#allocation3 + $0xd4] sm:$0xf]  ;;  %v3884_v33 = vor.u32 %v3471_v26, %v2481_v27 }
  0x10   :  { %4669 = vst [vmem:[#allocation15_spill] sm:$0xff] %v3876_v23  ;;  %v2545_v31 = vld [vmem:[#allocation3 + $0xd8] sm:$0xf0]  ;;  %v3886_v34 = vor.u32 %v3488_v29, %v2543_v28  ;;  %v2471_v36 = vld [vmem:[#allocation3 + $0x40] sm:$0xf]  ;;  %vm1377_vm9 = vcmask 1041408  }
  0x11   :  { %4670 = vst [vmem:[#allocation16_spill] sm:$0xff] %v3884_v33  ;;  %v3888_v35 = vor.u32 %v3487_v30, %v2545_v31  ;;  %v3470_v37 = vld [vmem:[#allocation3 + $0x44] sm:$0xf0]  ;;  %v3469_v38 = vld [vmem:[#allocation3 + $0x44] sm:$0xf]  ;;  %vm1381_vm10 = vcmask 1046534  }
  0x12   :  { %819 = vmatpush.bf16.xpose.msra.mxu0 %v3870_v20  ;;  %v2473_v39 = vld [vmem:[#allocation3 + $0x48] sm:$0xf0]  ;;  %v2535_v40 = vld [vmem:[#allocation3 + $0xc0] sm:$0xf]  ;;  %v3486_v41 = vld [vmem:[#allocation3 + $0xc4] sm:$0xf0]  ;;  %v3894_v44 = vor.u32 %v3470_v37, %v2471_v36 }
  0x13   :  { %832 = vmatpush.bf16.xpose.msra.mxu1 %v3872_v21  ;;  %4671 = vst [vmem:[#allocation17_spill] sm:$0xff] %v3888_v35  ;;  %v3485_v42 = vld [vmem:[#allocation3 + $0xc4] sm:$0xf]  ;;  %v2537_v43 = vld [vmem:[#allocation3 + $0xc8] sm:$0xf0]  ;;  %v3896_v45 = vor.u32 %v3469_v38, %v2473_v39  ;;  %v3898_v46 = vor.u32 %v3486_v41, %v2535_v40  ;;  %vm1383_vm11 = vcmask 1045508  }
  0x14   :  { %845 = vmatpush.bf16.xpose.msra.mxu2 %v3874_v22  ;;  %858 = vmatpush.bf16.xpose.msra.mxu3 %v3876_v23  ;;  %v3900_v47 = vor.u32 %v3485_v42, %v2537_v43  ;;  %v2463_v48 = vld [vmem:[#allocation3 + $0x30] sm:$0xf]  ;;  %v3468_v49 = vld [vmem:[#allocation3 + $0x34] sm:$0xf0]  ;;  %v3467_v50 = vld [vmem:[#allocation3 + $0x34] sm:$0xf] }
  0x15   :  { %4672 = vst [vmem:[#allocation18_spill] sm:$0xff] %v3896_v45  ;;  %v2465_v51 = vld [vmem:[#allocation3 + $0x38] sm:$0xf0]  ;;  %v2527_v52 = vld [vmem:[#allocation3 + $0xb0] sm:$0xf]  ;;  %v3906_v56 = vor.u32 %v3468_v49, %v2463_v48  ;;  %vm1385_vm12 = vcmask 1043456  }
  0x16   :  { %4673 = vst [vmem:[#allocation19_spill] sm:$0xff] %v3900_v47  ;;  %v3484_v53 = vld [vmem:[#allocation3 + $0xb4] sm:$0xf0]  ;;  %v3483_v54 = vld [vmem:[#allocation3 + $0xb4] sm:$0xf]  ;;  %v3908_v57 = vor.u32 %v3467_v50, %v2465_v51  ;;  %s2409_s21 = sshll.u32 %s4588_s5, 4  ;;  %s2410_s21 = int_to_ptr.hbm [resolvable:$true] %s2409_s21 }
  0x17   :  { %v2529_v55 = vld [vmem:[#allocation3 + $0xb8] sm:$0xf0]  ;;  %v3910_v58 = vor.u32 %v3484_v53, %v2527_v52  ;;  %v2455_v60 = vld [vmem:[#allocation3 + $0x20] sm:$0xf]  ;;  %v3466_v61 = vld [vmem:[#allocation3 + $0x24] sm:$0xf0] }
  0x18   :  { %4674 = vst [vmem:[#allocation20_spill] sm:$0xff] %v3908_v57  ;;  %v3912_v59 = vor.u32 %v3483_v54, %v2529_v55  ;;  %v3465_v62 = vld [vmem:[#allocation3 + $0x24] sm:$0xf]  ;;  %v2457_v63 = vld [vmem:[#allocation3 + $0x28] sm:$0xf0]  ;;  %v3918_v5 = vor.u32 %v3466_v61, %v2455_v60  ;;  %s3818_s22 = smov [#allocation6]  }
  0x19   :  { %v2519_v0 = vld [vmem:[#allocation3 + $0xa0] sm:$0xf]  ;;  %v3482_v1 = vld [vmem:[#allocation3 + $0xa4] sm:$0xf0]  ;;  %v3481_v2 = vld [vmem:[#allocation3 + $0xa4] sm:$0xf]  ;;  %v3920_v6 = vor.u32 %v3465_v62, %v2457_v63 }
  0x1a   :  { %820 = vmatpush.bf16.xpose.msra.mxu0 %v3882_v32  ;;  %4675 = vst [vmem:[#allocation21_spill] sm:$0xff] %v3912_v59  ;;  %v2521_v4 = vld [vmem:[#allocation3 + $0xa8] sm:$0xf0]  ;;  %v3922_v9 = vor.u32 %v3482_v1, %v2519_v0  ;;  %v2447_v12 = vld [vmem:[#allocation3 + $0x10] sm:$0xf]  ;;  %s2407_s23 = sshll.u32 %s3818_s22, 4  ;;  %s2408_s23 = int_to_ptr.vmem [resolvable:$true] %s2407_s23 }
  0x1b   :  { %833 = vmatpush.bf16.xpose.msra.mxu1 %v3884_v33  ;;  %4676 = vst [vmem:[#allocation22_spill] sm:$0xff] %v3920_v6  ;;  %v3924_v10 = vor.u32 %v3481_v2, %v2521_v4  ;;  %v3464_v13 = vld [vmem:[#allocation3 + $0x14] sm:$0xf0]  ;;  %v3463_v14 = vld [vmem:[#allocation3 + $0x14] sm:$0xf]  ;;  %s3819_s24 = smov [#allocation7]  }
  0x1c   :  { %846 = vmatpush.bf16.xpose.msra.mxu2 %v3886_v34  ;;  %859 = vmatpush.bf16.xpose.msra.mxu3 %v3888_v35  ;;  %v2449_v15 = vld [vmem:[#allocation3 + $0x18] sm:$0xf0]  ;;  %v2511_v16 = vld [vmem:[#allocation3 + $0x90] sm:$0xf]  ;;  %v3480_v17 = vld [vmem:[#allocation3 + $0x94] sm:$0xf0]  ;;  %v3930_v24 = vor.u32 %v3464_v13, %v2447_v12 }
  0x1d   :  { %4677 = vst [vmem:[#allocation23_spill] sm:$0xff] %v3924_v10  ;;  %v3479_v18 = vld [vmem:[#allocation3 + $0x94] sm:$0xf]  ;;  %v2513_v19 = vld [vmem:[#allocation3 + $0x98] sm:$0xf0]  ;;  %v3932_v25 = vor.u32 %v3463_v14, %v2449_v15  ;;  %v3934_v26 = vor.u32 %v3480_v17, %v2511_v16  ;;  %s2418_s25 = sshll.u32 %s3819_s24, 4  ;;  %s2419_s25 = int_to_ptr.vmem [resolvable:$true] %s2418_s25 }
  0x1e   :  { %v3936_v27 = vor.u32 %v3479_v18, %v2513_v19  ;;  %v2439_v28 = vld [vmem:[#allocation3] sm:$0xf]  ;;  %v3462_v29 = vld [vmem:[#allocation3 + $0x4] sm:$0xf0]  ;;  %v3461_v30 = vld [vmem:[#allocation3 + $0x4] sm:$0xf] }
  0x1f   :  { %4678 = vst [vmem:[#allocation24_spill] sm:$0xff] %v3932_v25  ;;  %v2441_v31 = vld [vmem:[#allocation3 + $0x8] sm:$0xf0]  ;;  %v2503_v36 = vld [vmem:[#allocation3 + $0x80] sm:$0xf]  ;;  %v3942_v43 = vor.u32 %v3462_v29, %v2439_v28  ;;  %s2420_s1 = sshll.u32 %s4589_s6, 4  ;;  %s2421_s1 = int_to_ptr.hbm [resolvable:$true] %s2420_s1 }
  0x20   :  { %4679 = vst [vmem:[#allocation25_spill] sm:$0xff] %v3936_v27  ;;  %v3478_v37 = vld [vmem:[#allocation3 + $0x84] sm:$0xf0]  ;;  %v3477_v38 = vld [vmem:[#allocation3 + $0x84] sm:$0xf]  ;;  %v3944_v51 = vor.u32 %v3461_v30, %v2441_v31 }
  0x21   :  { %v2505_v39 = vld [vmem:[#allocation3 + $0x88] sm:$0xf0]  ;;  %v2623_v40 = vld [vmem:[#allocation3 + $0x170] sm:$0xf]  ;;  %v3508_v41 = vld [vmem:[#allocation3 + $0x174] sm:$0xf0]  ;;  %v3946_v52 = vor.u32 %v3478_v37, %v2503_v36 }
  0x22   :  { %821 = vmatpush.bf16.xpose.msra.mxu0 %v3894_v44  ;;  %v3507_v42 = vld [vmem:[#allocation3 + $0x174] sm:$0xf]  ;;  %v2625_v48 = vld [vmem:[#allocation3 + $0x178] sm:$0xf0]  ;;  %v2687_v49 = vld [vmem:[#allocation3 + $0x1f0] sm:$0xf]  ;;  %v3948_v55 = vor.u32 %v3477_v38, %v2505_v39  ;;  %v3950_v60 = vor.u32 %v3508_v41, %v2623_v40 }
  0x23   :  { %834 = vmatpush.bf16.xpose.msra.mxu1 %v3896_v45  ;;  %v3524_v50 = vld [vmem:[#allocation3 + $0x1f4] sm:$0xf0]  ;;  %4680 = vst [vmem:[#allocation26_spill] sm:$0xff] %v3944_v51  ;;  %v3523_v53 = vld [vmem:[#allocation3 + $0x1f4] sm:$0xf]  ;;  %v3952_v61 = vor.u32 %v3507_v42, %v2625_v48 }
  0x24   :  { %847 = vmatpush.bf16.xpose.msra.mxu2 %v3898_v46  ;;  %860 = vmatpush.bf16.xpose.msra.mxu3 %v3900_v47  ;;  %v2689_v54 = vld [vmem:[#allocation3 + $0x1f8] sm:$0xf0]  ;;  %4681 = vst [vmem:[#allocation27_spill] sm:$0xff] %v3948_v55  ;;  %v3954_v62 = vor.u32 %v3524_v50, %v2687_v49  ;;  %v2615_v0 = vld [vmem:[#allocation3 + $0x160] sm:$0xf] }
  0x25   :  { %4682 = vst [vmem:[#allocation28_spill] sm:$0xff] %v3952_v61  ;;  %v3957_v63 = vor.u32 %v3523_v53, %v2689_v54  ;;  %v3506_v1 = vld [vmem:[#allocation3 + $0x164] sm:$0xf0]  ;;  %v3505_v2 = vld [vmem:[#allocation3 + $0x164] sm:$0xf] }
  0x26   :  { %v2617_v4 = vld [vmem:[#allocation3 + $0x168] sm:$0xf0]  ;;  %v2679_v12 = vld [vmem:[#allocation3 + $0x1e0] sm:$0xf]  ;;  %v3522_v13 = vld [vmem:[#allocation3 + $0x1e4] sm:$0xf0]  ;;  %v3966_v16 = vor.u32 %v3506_v1, %v2615_v0 }
  0x27   :  { %4683 = vst [vmem:[#allocation29_spill] sm:$0xff] %v3957_v63  ;;  %v3521_v14 = vld [vmem:[#allocation3 + $0x1e4] sm:$0xf]  ;;  %v2681_v15 = vld [vmem:[#allocation3 + $0x1e8] sm:$0xf0]  ;;  %v3968_v17 = vor.u32 %v3505_v2, %v2617_v4  ;;  %v3970_v18 = vor.u32 %v3522_v13, %v2679_v12 }
  0x28   :  { %v3972_v19 = vor.u32 %v3521_v14, %v2681_v15  ;;  %v2607_v28 = vld [vmem:[#allocation3 + $0x150] sm:$0xf]  ;;  %v3504_v29 = vld [vmem:[#allocation3 + $0x154] sm:$0xf0]  ;;  %v3503_v30 = vld [vmem:[#allocation3 + $0x154] sm:$0xf] }
  0x29   :  { %4684 = vst [vmem:[#allocation30_spill] sm:$0xff] %v3968_v17  ;;  %v2609_v31 = vld [vmem:[#allocation3 + $0x158] sm:$0xf0]  ;;  %v2671_v36 = vld [vmem:[#allocation3 + $0x1d0] sm:$0xf]  ;;  %v3981_v48 = vor.u32 %v3504_v29, %v2607_v28 }
  0x2a   :  { %822 = vmatpush.bf16.xpose.msra.mxu0 %v3906_v56  ;;  %4685 = vst [vmem:[#allocation31_spill] sm:$0xff] %v3972_v19  ;;  %v3520_v37 = vld [vmem:[#allocation3 + $0x1d4] sm:$0xf0]  ;;  %v170_v38 = vld [vmem:[%s4586_s3] sm:$0x3]  ;;  %v3983_v49 = vor.u32 %v3503_v30, %v2609_v31 }
  0x2b   :  { %835 = vmatpush.bf16.xpose.msra.mxu1 %v3908_v57  ;;  %v3519_v39 = vld [vmem:[#allocation3 + $0x1d4] sm:$0xf]  ;;  %v2673_v40 = vld [vmem:[#allocation3 + $0x1d8] sm:$0xf0]  ;;  %v172_v41 = vperm.slane %v170_v38, 0  ;;  %v173_v42 = vperm.slane %v170_v38, 1  ;;  %v3985_v50 = vor.u32 %v3520_v37, %v2671_v36 }
  0x2c   :  { %848 = vmatpush.bf16.xpose.msra.mxu2 %v3910_v58  ;;  %861 = vmatpush.bf16.xpose.msra.mxu3 %v3912_v59  ;;  %4686 = vst [vmem:[#allocation32_spill] sm:$0xff] %v3983_v49  ;;  %v3991_v0 = vor.u32 %v3519_v39, %v2673_v40  ;;  %v2599_v1 = vld [vmem:[#allocation3 + $0x140] sm:$0xf]  ;;  %v3502_v2 = vld [vmem:[#allocation3 + $0x144] sm:$0xf0] }
  0x2d   :  { %v3987_v53 = vpack.c.bf16 %v172_v41, %v172_v41  ;;  %v3989_v54 = vpack.c.bf16 %v173_v42, %v173_v42  ;;  %v3501_v4 = vld [vmem:[#allocation3 + $0x144] sm:$0xf]  ;;  %v2601_v12 = vld [vmem:[#allocation3 + $0x148] sm:$0xf0]  ;;  %v2663_v13 = vld [vmem:[#allocation3 + $0x1c0] sm:$0xf]  ;;  %v4001_v29 = vor.u32 %v3502_v2, %v2599_v1 }
  0x2e   :  { %4687 = vst [vmem:[#allocation33_spill] sm:$0xff] %v3991_v0  ;;  %v3518_v14 = vld [vmem:[#allocation3 + $0x1c4] sm:$0xf0]  ;;  %v3517_v15 = vld [vmem:[#allocation3 + $0x1c4] sm:$0xf]  ;;  %v4003_v30 = vor.u32 %v3501_v4, %v2601_v12 }
  0x2f   :  { %v2665_v28 = vld [vmem:[#allocation3 + $0x1c8] sm:$0xf0]  ;;  %v4005_v31 = vor.u32 %v3518_v14, %v2663_v13  ;;  %v2591_v37 = vld [vmem:[#allocation3 + $0x130] sm:$0xf]  ;;  %v3500_v38 = vld [vmem:[#allocation3 + $0x134] sm:$0xf0] }
  0x30   :  { %4688 = vst [vmem:[#allocation34_spill] sm:$0xff] %v4003_v30  ;;  %v4007_v36 = vor.u32 %v3517_v15, %v2665_v28  ;;  %v3499_v39 = vld [vmem:[#allocation3 + $0x134] sm:$0xf]  ;;  %v2593_v40 = vld [vmem:[#allocation3 + $0x138] sm:$0xf0]  ;;  %v4013_v4 = vor.u32 %v3500_v38, %v2591_v37 }
  0x31   :  { %v2655_v41 = vld [vmem:[#allocation3 + $0x1b0] sm:$0xf]  ;;  %v3516_v42 = vld [vmem:[#allocation3 + $0x1b4] sm:$0xf0]  ;;  %v3515_v1 = vld [vmem:[#allocation3 + $0x1b4] sm:$0xf]  ;;  %v4015_v12 = vor.u32 %v3499_v39, %v2593_v40 }
  0x32   :  { %823 = vmatpush.bf16.xpose.msra.mxu0 %v3918_v5  ;;  %4689 = vst [vmem:[#allocation35_spill] sm:$0xff] %v4007_v36  ;;  %v2657_v2 = vld [vmem:[#allocation3 + $0x1b8] sm:$0xf0]  ;;  %v4017_v13 = vor.u32 %v3516_v42, %v2655_v41  ;;  %v2583_v15 = vld [vmem:[#allocation3 + $0x120] sm:$0xf] }
  0x33   :  { %836 = vmatpush.bf16.xpose.msra.mxu1 %v3920_v6  ;;  %4690 = vst [vmem:[#allocation36_spill] sm:$0xff] %v4015_v12  ;;  %v4019_v14 = vor.u32 %v3515_v1, %v2657_v2  ;;  %v3498_v28 = vld [vmem:[#allocation3 + $0x124] sm:$0xf0]  ;;  %v2647_v37 = vld [vmem:[#allocation3 + $0x1a0] sm:$0xf] }
  0x34   :  { %849 = vmatpush.bf16.xpose.msra.mxu2 %v3922_v9  ;;  %862 = vmatpush.bf16.xpose.msra.mxu3 %v3924_v10  ;;  %v3514_v38 = vld [vmem:[#allocation3 + $0x1a4] sm:$0xf0]  ;;  %v3513_v39 = vld [vmem:[#allocation3 + $0x1a4] sm:$0xf]  ;;  %v2649_v40 = vld [vmem:[#allocation3 + $0x1a8] sm:$0xf0]  ;;  %v4025_v41 = vor.u32 %v3498_v28, %v2583_v15 }
  0x35   :  { %4691 = vst [vmem:[#allocation37_spill] sm:$0xff] %v4019_v14  ;;  %v4029_v1 = vor.u32 %v3514_v38, %v2647_v37  ;;  %v4031_v2 = vor.u32 %v3513_v39, %v2649_v40  ;;  %v3495_v10 = vld [vmem:[#allocation3 + $0x114] sm:$0xf]  ;;  %v2577_v6 = vld [vmem:[#allocation3 + $0x118] sm:$0xf0] }
  0x36   :  { %v2639_v15 = vld [vmem:[#allocation3 + $0x190] sm:$0xf]  ;;  %v3512_v28 = vld [vmem:[#allocation3 + $0x194] sm:$0xf0]  ;;  %v4039_v38 = vor.u32 %v3495_v10, %v2577_v6  ;;  %v2631_v59 = vld [vmem:[#allocation3 + $0x180] sm:$0xf] }
  0x37   :  { %4693 = vst [vmem:[#allocation39_spill] sm:$0xff] %v4031_v2  ;;  %v4041_v39 = vor.u32 %v3512_v28, %v2639_v15  ;;  %v3509_v6 = vld [vmem:[#allocation3 + $0x184] sm:$0xf]  ;;  %v2633_v10 = vld [vmem:[#allocation3 + $0x188] sm:$0xf0] }
  0x38   :  { %4694 = vst [vmem:[#allocation40_spill] sm:$0xff] %v4039_v38  ;;  %v3540_v15 = vld [vmem:[#allocation3 + $0x274] sm:$0xf0]  ;;  %v3539_v28 = vld [vmem:[#allocation3 + $0x274] sm:$0xf] }
  0x39   :  { %v2815_v57 = vld [vmem:[#allocation3 + $0x2f0] sm:$0xf]  ;;  %v3555_v47 = vld [vmem:[#allocation3 + $0x2f4] sm:$0xf]  ;;  %v2817_v45 = vld [vmem:[#allocation3 + $0x2f8] sm:$0xf0] }
  0x3a   :  { %824 = vmatpush.bf16.xpose.msra.mxu0 %v3930_v24  ;;  %v2721_v33 = vld [vmem:[#allocation3 + $0x238] sm:$0xf0]  ;;  %v3527_v23 = vld [vmem:[#allocation3 + $0x214] sm:$0xf]  ;;  %v2759_v11 = vld [vmem:[#allocation3 + $0x280] sm:$0xf] }
  0x3b   :  { %837 = vmatpush.bf16.xpose.msra.mxu1 %v3932_v25  ;;  %v3496_v25 = vld [vmem:[#allocation3 + $0x114] sm:$0xf0]  ;;  %v2705_v21 = vld [vmem:[#allocation3 + $0x218] sm:$0xf0]  ;;  %v2943_v7 = vld [vmem:[#allocation3 + $0x3f0] sm:$0xf] }
  0x3c   :  { %850 = vmatpush.bf16.xpose.msra.mxu2 %v3934_v26  ;;  %863 = vmatpush.bf16.xpose.msra.mxu3 %v3936_v27  ;;  %v2575_v27 = vld [vmem:[#allocation3 + $0x110] sm:$0xf] }
  0x3d   :  { %v4037_v37 = vor.u32 %v3496_v25, %v2575_v27  ;;  %v3510_v25 = vld [vmem:[#allocation3 + $0x184] sm:$0xf0]  ;;  %v2751_v27 = vld [vmem:[#allocation3 + $0x270] sm:$0xf] }
  0x42   :  { %825 = vmatpush.bf16.xpose.msra.mxu0 %v3942_v43 }
  0x43   :  { %838 = vmatpush.bf16.xpose.msra.mxu1 %v3944_v51  ;;  %v2585_v51 = vld [vmem:[#allocation3 + $0x128] sm:$0xf0] }
  0x44   :  { %851 = vmatpush.bf16.xpose.msra.mxu2 %v3946_v52  ;;  %864 = vmatpush.bf16.xpose.msra.mxu3 %v3948_v55  ;;  %v3497_v55 = vld [vmem:[#allocation3 + $0x124] sm:$0xf] }
  0x45   :  { %v4027_v42 = vor.u32 %v3497_v55, %v2585_v51  ;;  %v3511_v51 = vld [vmem:[#allocation3 + $0x194] sm:$0xf]  ;;  %v2641_v55 = vld [vmem:[#allocation3 + $0x198] sm:$0xf0] }
  0x46   :  { %v4043_v40 = vor.u32 %v3511_v51, %v2641_v55  ;;  %v2753_v55 = vld [vmem:[#allocation3 + $0x278] sm:$0xf0] }
  0x47   :  { %4692 = vst [vmem:[#allocation38_spill] sm:$0xff] %v4027_v42 }
  0x48   :  { %4695 = vst [vmem:[#allocation41_spill] sm:$0xff] %v4043_v40 }
  0x49   :  { %826 = vmatmul.bf16.vlgmr.msra.gmra.mxu0 %v3987_v53 }
  0x4a   :  { %870 = vmatpush.bf16.xpose.msrb.mxu0 %v3950_v60  ;;  %839 = vmatmul.bf16.vlgmr.msra.gmra.mxu1 %v3989_v54 }
  0x4b   :  { %883 = vmatpush.bf16.xpose.msrb.mxu1 %v3952_v61  ;;  %852 = vmatmul.bf16.vlgmr.msra.gmra.mxu2 %v3987_v53  ;;  %v2697_v61 = vld [vmem:[#allocation3 + $0x208] sm:$0xf0] }
  0x4c   :  { %896 = vmatpush.bf16.xpose.msrb.mxu2 %v3954_v62  ;;  %909 = vmatpush.bf16.xpose.msrb.mxu3 %v3957_v63  ;;  %v3526_v63 = vld [vmem:[#allocation3 + $0x204] sm:$0xf0] }
  0x4d   :  { %865 = vmatmul.bf16.vlgmr.msra.gmra.mxu3 %v3989_v54 }
  0x52   :  { %871 = vmatpush.bf16.xpose.msrb.mxu0 %v3966_v16 }
  0x53   :  { %884 = vmatpush.bf16.xpose.msrb.mxu1 %v3968_v17  ;;  %v2713_v17 = vld [vmem:[#allocation3 + $0x228] sm:$0xf0] }
  0x54   :  { %897 = vmatpush.bf16.xpose.msrb.mxu2 %v3970_v18  ;;  %910 = vmatpush.bf16.xpose.msrb.mxu3 %v3972_v19  ;;  %v3529_v19 = vld [vmem:[#allocation3 + $0x224] sm:$0xf] }
  0x5a   :  { %872 = vmatpush.bf16.xpose.msrb.mxu0 %v3981_v48 }
  0x5b   :  { %885 = vmatpush.bf16.xpose.msrb.mxu1 %v3983_v49  ;;  %v4059_v49 = vor.u32 %v3539_v28, %v2753_v55  ;;  %v3536_v28 = vld [vmem:[#allocation3 + $0x254] sm:$0xf0]  ;;  %v3535_v55 = vld [vmem:[#allocation3 + $0x254] sm:$0xf] }
  0x5c   :  { %898 = vmatpush.bf16.xpose.msrb.mxu2 %v3985_v50  ;;  %911 = vmatpush.bf16.xpose.msrb.mxu3 %v3991_v0  ;;  %v4055_v0 = vor.u32 %v3509_v6, %v2633_v10 }
  0x5d   :  { %4698 = vst [vmem:[#allocation44_spill] sm:$0xff] %v4059_v49 }
  0x5e   :  { %4697 = vst [vmem:[#allocation43_spill] sm:$0xff] %v4055_v0 }
  0x62   :  { %873 = vmatpush.bf16.xpose.msrb.mxu0 %v4001_v29 }
  0x63   :  { %886 = vmatpush.bf16.xpose.msrb.mxu1 %v4003_v30 }
  0x64   :  { %899 = vmatpush.bf16.xpose.msrb.mxu2 %v4005_v31  ;;  %912 = vmatpush.bf16.xpose.msrb.mxu3 %v4007_v36  ;;  %v3556_v36 = vld [vmem:[#allocation3 + $0x2f4] sm:$0xf0] }
  0x65   :  { %v4061_v35 = vor.u32 %v3556_v36, %v2815_v57  ;;  %v3537_v57 = vld [vmem:[#allocation3 + $0x264] sm:$0xf]  ;;  %v2745_v36 = vld [vmem:[#allocation3 + $0x268] sm:$0xf0] }
  0x66   :  { %v4076_v6 = vor.u32 %v3537_v57, %v2745_v36  ;;  %v3552_v57 = vld [vmem:[#allocation3 + $0x2d4] sm:$0xf0]  ;;  %v3551_v36 = vld [vmem:[#allocation3 + $0x2d4] sm:$0xf] }
  0x68   :  { %4700 = vst [vmem:[#allocation46_spill] sm:$0xff] %v4076_v6 }
  0x6a   :  { %874 = vmatpush.bf16.xpose.msrb.mxu0 %v4013_v4 }
  0x6b   :  { %887 = vmatpush.bf16.xpose.msrb.mxu1 %v4015_v12  ;;  %v2569_v12 = vld [vmem:[#allocation3 + $0x108] sm:$0xf0] }
  0x6c   :  { %900 = vmatpush.bf16.xpose.msrb.mxu2 %v4017_v13  ;;  %913 = vmatpush.bf16.xpose.msrb.mxu3 %v4019_v14  ;;  %v3494_v14 = vld [vmem:[#allocation3 + $0x104] sm:$0xf0] }
  0x72   :  { %875 = vmatpush.bf16.xpose.msrb.mxu0 %v4025_v41 }
  0x73   :  { %888 = vmatpush.bf16.xpose.msrb.mxu1 %v4027_v42  ;;  %v2567_v42 = vld [vmem:[#allocation3 + $0x100] sm:$0xf] }
  0x74   :  { %901 = vmatpush.bf16.xpose.msrb.mxu2 %v4029_v1  ;;  %914 = vmatpush.bf16.xpose.msrb.mxu3 %v4031_v2  ;;  %v3493_v2 = vld [vmem:[#allocation3 + $0x104] sm:$0xf]  ;;  %v4049_v51 = vor.u32 %v3494_v14, %v2567_v42  ;;  %v4064_v14 = vor.u32 %v3555_v47, %v2817_v45  ;;  %v2807_v45 = vld [vmem:[#allocation3 + $0x2e0] sm:$0xf]  ;;  %v3554_v47 = vld [vmem:[#allocation3 + $0x2e4] sm:$0xf0] }
  0x75   :  { %v4051_v30 = vor.u32 %v3493_v2, %v2569_v12  ;;  %v3538_v12 = vld [vmem:[#allocation3 + $0x264] sm:$0xf0]  ;;  %v3553_v42 = vld [vmem:[#allocation3 + $0x2e4] sm:$0xf]  ;;  %v2809_v2 = vld [vmem:[#allocation3 + $0x2e8] sm:$0xf0]  ;;  %v4078_v10 = vor.u32 %v3554_v47, %v2807_v45 }
  0x76   :  { %4699 = vst [vmem:[#allocation45_spill] sm:$0xff] %v4064_v14  ;;  %v2801_v45 = vld [vmem:[#allocation3 + $0x2d8] sm:$0xf0] }
  0x77   :  { %4696 = vst [vmem:[#allocation42_spill] sm:$0xff] %v4051_v30 }
  0x7a   :  { %876 = vmatpush.bf16.xpose.msrb.mxu0 %v4037_v37 }
  0x7b   :  { %889 = vmatpush.bf16.xpose.msrb.mxu1 %v4039_v38  ;;  %v4053_v38 = vor.u32 %v3510_v25, %v2631_v59  ;;  %v2743_v59 = vld [vmem:[#allocation3 + $0x260] sm:$0xf] }
  0x7c   :  { %902 = vmatpush.bf16.xpose.msrb.mxu2 %v4041_v39  ;;  %915 = vmatpush.bf16.xpose.msrb.mxu3 %v4043_v40  ;;  %v4057_v40 = vor.u32 %v3540_v15, %v2751_v27  ;;  %v4073_v25 = vor.u32 %v3538_v12, %v2743_v59  ;;  %v4082_v27 = vor.u32 %v3553_v42, %v2809_v2  ;;  %v2735_v15 = vld [vmem:[#allocation3 + $0x250] sm:$0xf]  ;;  %v2737_v59 = vld [vmem:[#allocation3 + $0x258] sm:$0xf0] }
  0x7d   :  { %v2799_v12 = vld [vmem:[#allocation3 + $0x2d0] sm:$0xf]  ;;  %v4089_v47 = vor.u32 %v3536_v28, %v2735_v15  ;;  %v4091_v42 = vor.u32 %v3535_v55, %v2737_v59  ;;  %v2791_v15 = vld [vmem:[#allocation3 + $0x2c0] sm:$0xf]  ;;  %v3550_v28 = vld [vmem:[#allocation3 + $0x2c4] sm:$0xf0] }
  0x7e   :  { %4701 = vst [vmem:[#allocation47_spill] sm:$0xff] %v4082_v27  ;;  %v4093_v2 = vor.u32 %v3552_v57, %v2799_v12  ;;  %v3549_v55 = vld [vmem:[#allocation3 + $0x2c4] sm:$0xf]  ;;  %v2793_v59 = vld [vmem:[#allocation3 + $0x2c8] sm:$0xf0] }
  0x7f   :  { %4702 = vst [vmem:[#allocation48_spill] sm:$0xff] %v4091_v42 }
  0x82   :  { %877 = vmatpush.bf16.xpose.msrb.mxu0 %v4049_v51 }
  0x83   :  { %890 = vmatpush.bf16.xpose.msrb.mxu1 %v4051_v30  ;;  %v3531_v30 = vld [vmem:[#allocation3 + $0x234] sm:$0xf] }
  0x84   :  { %903 = vmatpush.bf16.xpose.msrb.mxu2 %v4053_v38  ;;  %916 = vmatpush.bf16.xpose.msrb.mxu3 %v4055_v0  ;;  %v2729_v0 = vld [vmem:[#allocation3 + $0x248] sm:$0xf0] }
  0x89   :  { %878 = vmatmul.bf16.vlgmr.msrb.gmra.mxu0 %v3987_v53 }
  0x8a   :  { %922 = vmatpush.bf16.xpose.msra.mxu0 %v4057_v40  ;;  %891 = vmatmul.bf16.vlgmr.msrb.gmra.mxu1 %v3989_v54 }
  0x8b   :  { %935 = vmatpush.bf16.xpose.msra.mxu1 %v4059_v49  ;;  %904 = vmatmul.bf16.vlgmr.msrb.gmra.mxu2 %v3987_v53  ;;  %v3533_v49 = vld [vmem:[#allocation3 + $0x244] sm:$0xf] }
  0x8c   :  { %948 = vmatpush.bf16.xpose.msra.mxu2 %v4061_v35  ;;  %961 = vmatpush.bf16.xpose.msra.mxu3 %v4064_v14  ;;  %v4095_v14 = vor.u32 %v3551_v36, %v2801_v45  ;;  %v4103_v57 = vor.u32 %v3533_v49, %v2729_v0  ;;  %v4105_v36 = vor.u32 %v3550_v28, %v2791_v15  ;;  %v3547_v49 = vld [vmem:[#allocation3 + $0x2b4] sm:$0xf]  ;;  %v2785_v0 = vld [vmem:[#allocation3 + $0x2b8] sm:$0xf0] }
  0x8d   :  { %917 = vmatmul.bf16.vlgmr.msrb.gmra.mxu3 %v3989_v54  ;;  %v4107_v45 = vor.u32 %v3549_v55, %v2793_v59  ;;  %v4115_v28 = vor.u32 %v3531_v30, %v2721_v33  ;;  %v4119_v59 = vor.u32 %v3547_v49, %v2785_v0  ;;  %v3545_v33 = vld [vmem:[#allocation3 + $0x2a4] sm:$0xf]  ;;  %v2777_v30 = vld [vmem:[#allocation3 + $0x2a8] sm:$0xf0] }
  0x8e   :  { %4703 = vst [vmem:[#allocation49_spill] sm:$0xff] %v4095_v14  ;;  %v4131_v0 = vor.u32 %v3545_v33, %v2777_v30 }
  0x8f   :  { %4705 = vst [vmem:[#allocation51_spill] sm:$0xff] %v4103_v57 }
  0x90   :  { %4706 = vst [vmem:[#allocation52_spill] sm:$0xff] %v4105_v36 }
  0x91   :  { %4707 = vst [vmem:[#allocation53_spill] sm:$0xff] %v4107_v45 }
  0x92   :  { %923 = vmatpush.bf16.xpose.msra.mxu0 %v4073_v25  ;;  %4709 = vst [vmem:[#allocation55_spill] sm:$0xff] %v4115_v28 }
  0x93   :  { %936 = vmatpush.bf16.xpose.msra.mxu1 %v4076_v6  ;;  %v3534_v6 = vld [vmem:[#allocation3 + $0x244] sm:$0xf0]  ;;  %4711 = vst [vmem:[#allocation57_spill] sm:$0xff] %v4119_v59 }
  0x94   :  { %949 = vmatpush.bf16.xpose.msra.mxu2 %v4078_v10  ;;  %962 = vmatpush.bf16.xpose.msra.mxu3 %v4082_v27  ;;  %v2727_v27 = vld [vmem:[#allocation3 + $0x240] sm:$0xf]  ;;  %4715 = vst [vmem:[#allocation61_spill] sm:$0xff] %v4131_v0 }
  0x95   :  { %v4101_v12 = vor.u32 %v3534_v6, %v2727_v27  ;;  %v2783_v6 = vld [vmem:[#allocation3 + $0x2b0] sm:$0xf]  ;;  %v3548_v27 = vld [vmem:[#allocation3 + $0x2b4] sm:$0xf0] }
  0x96   :  { %v4117_v55 = vor.u32 %v3548_v27, %v2783_v6  ;;  %v4127_v27 = vor.u32 %v3529_v19, %v2713_v17  ;;  %v3543_v17 = vld [vmem:[#allocation3 + $0x294] sm:$0xf]  ;;  %v2769_v19 = vld [vmem:[#allocation3 + $0x298] sm:$0xf0] }
  0x97   :  { %4704 = vst [vmem:[#allocation50_spill] sm:$0xff] %v4101_v12  ;;  %v4143_v30 = vor.u32 %v3543_v17, %v2769_v19  ;;  %v2881_v19 = vld [vmem:[#allocation3 + $0x378] sm:$0xf0] }
  0x98   :  { %4710 = vst [vmem:[#allocation56_spill] sm:$0xff] %v4117_v55 }
  0x99   :  { %4713 = vst [vmem:[#allocation59_spill] sm:$0xff] %v4127_v27 }
  0x9a   :  { %924 = vmatpush.bf16.xpose.msra.mxu0 %v4089_v47  ;;  %4719 = vst [vmem:[#allocation65_spill] sm:$0xff] %v4143_v30 }
  0x9b   :  { %937 = vmatpush.bf16.xpose.msra.mxu1 %v4091_v42  ;;  %v3532_v42 = vld [vmem:[#allocation3 + $0x234] sm:$0xf0] }
  0x9c   :  { %950 = vmatpush.bf16.xpose.msra.mxu2 %v4093_v2  ;;  %963 = vmatpush.bf16.xpose.msra.mxu3 %v4095_v14  ;;  %v2719_v14 = vld [vmem:[#allocation3 + $0x230] sm:$0xf] }
  0x9d   :  { %v4113_v15 = vor.u32 %v3532_v42, %v2719_v14  ;;  %v2775_v14 = vld [vmem:[#allocation3 + $0x2a0] sm:$0xf]  ;;  %v3546_v42 = vld [vmem:[#allocation3 + $0x2a4] sm:$0xf0] }
  0x9e   :  { %v4129_v49 = vor.u32 %v3546_v42, %v2775_v14  ;;  %v4139_v42 = vor.u32 %v3527_v23, %v2705_v21  ;;  %v3541_v21 = vld [vmem:[#allocation3 + $0x284] sm:$0xf]  ;;  %v2761_v23 = vld [vmem:[#allocation3 + $0x288] sm:$0xf0] }
  0x9f   :  { %4708 = vst [vmem:[#allocation54_spill] sm:$0xff] %v4113_v15 }
  0xa0   :  { %4714 = vst [vmem:[#allocation60_spill] sm:$0xff] %v4129_v49 }
  0xa1   :  { %4717 = vst [vmem:[#allocation63_spill] sm:$0xff] %v4139_v42 }
  0xa2   :  { %925 = vmatpush.bf16.xpose.msra.mxu0 %v4101_v12  ;;  %v3561_v12 = vld [vmem:[#allocation3 + $0x324] sm:$0xf] }
  0xa3   :  { %938 = vmatpush.bf16.xpose.msra.mxu1 %v4103_v57  ;;  %v3530_v57 = vld [vmem:[#allocation3 + $0x224] sm:$0xf0] }
  0xa4   :  { %951 = vmatpush.bf16.xpose.msra.mxu2 %v4105_v36  ;;  %964 = vmatpush.bf16.xpose.msra.mxu3 %v4107_v45  ;;  %v2711_v45 = vld [vmem:[#allocation3 + $0x220] sm:$0xf] }
  0xa5   :  { %v4125_v6 = vor.u32 %v3530_v57, %v2711_v45  ;;  %v2767_v57 = vld [vmem:[#allocation3 + $0x290] sm:$0xf]  ;;  %v3544_v45 = vld [vmem:[#allocation3 + $0x294] sm:$0xf0] }
  0xa6   :  { %v4141_v33 = vor.u32 %v3544_v45, %v2767_v57  ;;  %v3572_v57 = vld [vmem:[#allocation3 + $0x374] sm:$0xf0]  ;;  %v3571_v45 = vld [vmem:[#allocation3 + $0x374] sm:$0xf] }
  0xa7   :  { %4712 = vst [vmem:[#allocation58_spill] sm:$0xff] %v4125_v6 }
  0xa8   :  { %4718 = vst [vmem:[#allocation64_spill] sm:$0xff] %v4141_v33 }
  0xaa   :  { %926 = vmatpush.bf16.xpose.msra.mxu0 %v4113_v15  ;;  %v4159_v15 = vor.u32 %v3571_v45, %v2881_v19  ;;  %v3568_v45 = vld [vmem:[#allocation3 + $0x354] sm:$0xf0]  ;;  %v3567_v19 = vld [vmem:[#allocation3 + $0x354] sm:$0xf] }
  0xab   :  { %939 = vmatpush.bf16.xpose.msra.mxu1 %v4115_v28  ;;  %v3528_v28 = vld [vmem:[#allocation3 + $0x214] sm:$0xf0] }
  0xac   :  { %952 = vmatpush.bf16.xpose.msra.mxu2 %v4117_v55  ;;  %965 = vmatpush.bf16.xpose.msra.mxu3 %v4119_v59  ;;  %v2703_v59 = vld [vmem:[#allocation3 + $0x210] sm:$0xf]  ;;  %v4155_v55 = vor.u32 %v3541_v21, %v2761_v23  ;;  %4724 = vst [vmem:[#allocation70_spill] sm:$0xff] %v4159_v15 }
  0xad   :  { %v4137_v14 = vor.u32 %v3528_v28, %v2703_v59  ;;  %v3542_v28 = vld [vmem:[#allocation3 + $0x284] sm:$0xf0]  ;;  %v2879_v59 = vld [vmem:[#allocation3 + $0x370] sm:$0xf] }
  0xae   :  { %4723 = vst [vmem:[#allocation69_spill] sm:$0xff] %v4155_v55 }
  0xaf   :  { %4716 = vst [vmem:[#allocation62_spill] sm:$0xff] %v4137_v14 }
  0xb2   :  { %927 = vmatpush.bf16.xpose.msra.mxu0 %v4125_v6  ;;  %v2945_v6 = vld [vmem:[#allocation3 + $0x3f8] sm:$0xf0] }
  0xb3   :  { %940 = vmatpush.bf16.xpose.msra.mxu1 %v4127_v27  ;;  %v2695_v27 = vld [vmem:[#allocation3 + $0x200] sm:$0xf] }
  0xb4   :  { %953 = vmatpush.bf16.xpose.msra.mxu2 %v4129_v49  ;;  %966 = vmatpush.bf16.xpose.msra.mxu3 %v4131_v0  ;;  %v3525_v0 = vld [vmem:[#allocation3 + $0x204] sm:$0xf]  ;;  %v4149_v17 = vor.u32 %v3526_v63, %v2695_v27  ;;  %v2873_v27 = vld [vmem:[#allocation3 + $0x368] sm:$0xf0] }
  0xb5   :  { %v4151_v49 = vor.u32 %v3525_v0, %v2697_v61  ;;  %v3570_v61 = vld [vmem:[#allocation3 + $0x364] sm:$0xf0] }
  0xb6   :  { %4720 = vst [vmem:[#allocation66_spill] sm:$0xff] %v4149_v17  ;;  %v3586_v0 = vld [vmem:[#allocation3 + $0x3e4] sm:$0xf0] }
  0xb7   :  { %4721 = vst [vmem:[#allocation67_spill] sm:$0xff] %v4151_v49 }
  0xba   :  { %928 = vmatpush.bf16.xpose.msra.mxu0 %v4137_v14  ;;  %v3588_v14 = vld [vmem:[#allocation3 + $0x3f4] sm:$0xf0] }
  0xbb   :  { %941 = vmatpush.bf16.xpose.msra.mxu1 %v4139_v42  ;;  %v4153_v42 = vor.u32 %v3542_v28, %v2759_v11  ;;  %v4161_v36 = vor.u32 %v3588_v14, %v2943_v7  ;;  %v2871_v11 = vld [vmem:[#allocation3 + $0x360] sm:$0xf]  ;;  %v3569_v7 = vld [vmem:[#allocation3 + $0x364] sm:$0xf] }
  0xbc   :  { %954 = vmatpush.bf16.xpose.msra.mxu2 %v4141_v33  ;;  %967 = vmatpush.bf16.xpose.msra.mxu3 %v4143_v30  ;;  %v3587_v33 = vld [vmem:[#allocation3 + $0x3f4] sm:$0xf]  ;;  %v4157_v30 = vor.u32 %v3572_v57, %v2879_v59  ;;  %v3585_v14 = vld [vmem:[#allocation3 + $0x3e4] sm:$0xf]  ;;  %v4173_v28 = vor.u32 %v3570_v61, %v2871_v11  ;;  %v4176_v21 = vor.u32 %v3569_v7, %v2873_v27  ;;  %v2863_v57 = vld [vmem:[#allocation3 + $0x350] sm:$0xf] }
  0xbd   :  { %4722 = vst [vmem:[#allocation68_spill] sm:$0xff] %v4153_v42  ;;  %v4164_v63 = vor.u32 %v3587_v33, %v2945_v6  ;;  %v2935_v6 = vld [vmem:[#allocation3 + $0x3e0] sm:$0xf]  ;;  %v2937_v33 = vld [vmem:[#allocation3 + $0x3e8] sm:$0xf0] }
  0xbe   :  { %4726 = vst [vmem:[#allocation72_spill] sm:$0xff] %v4176_v21  ;;  %v4178_v23 = vor.u32 %v3586_v0, %v2935_v6  ;;  %v4182_v59 = vor.u32 %v3585_v14, %v2937_v33  ;;  %v2865_v11 = vld [vmem:[#allocation3 + $0x358] sm:$0xf0]  ;;  %v2927_v61 = vld [vmem:[#allocation3 + $0x3d0] sm:$0xf]  ;;  %v4189_v0 = vor.u32 %v3568_v45, %v2863_v57 }
  0xbf   :  { %4725 = vst [vmem:[#allocation71_spill] sm:$0xff] %v4164_v63  ;;  %v3584_v7 = vld [vmem:[#allocation3 + $0x3d4] sm:$0xf0]  ;;  %v3583_v27 = vld [vmem:[#allocation3 + $0x3d4] sm:$0xf]  ;;  %v4191_v14 = vor.u32 %v3567_v19, %v2865_v11 }
  0xc0   :  { %4727 = vst [vmem:[#allocation73_spill] sm:$0xff] %v4182_v59  ;;  %v2929_v6 = vld [vmem:[#allocation3 + $0x3d8] sm:$0xf0]  ;;  %v4193_v33 = vor.u32 %v3584_v7, %v2927_v61  ;;  %v2919_v57 = vld [vmem:[#allocation3 + $0x3c0] sm:$0xf] }
  0xc1   :  { %4728 = vst [vmem:[#allocation74_spill] sm:$0xff] %v4191_v14  ;;  %v3582_v45 = vld [vmem:[#allocation3 + $0x3c4] sm:$0xf0]  ;;  %v3581_v19 = vld [vmem:[#allocation3 + $0x3c4] sm:$0xf] }
  0xc2   :  { %929 = vmatpush.bf16.xpose.msra.mxu0 %v4149_v17  ;;  %4729 = vst [vmem:[#allocation75_spill] sm:$0xff] %v4193_v33  ;;  %v2921_v11 = vld [vmem:[#allocation3 + $0x3c8] sm:$0xf0] }
  0xc3   :  { %942 = vmatpush.bf16.xpose.msra.mxu1 %v4151_v49  ;;  %v2855_v49 = vld [vmem:[#allocation3 + $0x340] sm:$0xf] }
  0xc4   :  { %955 = vmatpush.bf16.xpose.msra.mxu2 %v4153_v42  ;;  %968 = vmatpush.bf16.xpose.msra.mxu3 %v4155_v55  ;;  %v4195_v55 = vor.u32 %v3583_v27, %v2929_v6  ;;  %v4205_v27 = vor.u32 %v3582_v45, %v2919_v57  ;;  %v4207_v6 = vor.u32 %v3581_v19, %v2921_v11  ;;  %v2849_v42 = vld [vmem:[#allocation3 + $0x338] sm:$0xf0]  ;;  %v3579_v57 = vld [vmem:[#allocation3 + $0x3b4] sm:$0xf] }
  0xc5   :  { %v2913_v45 = vld [vmem:[#allocation3 + $0x3b8] sm:$0xf0] }
  0xc6   :  { %4730 = vst [vmem:[#allocation76_spill] sm:$0xff] %v4195_v55 }
  0xc7   :  { %4733 = vst [vmem:[#allocation79_spill] sm:$0xff] %v4205_v27 }
  0xc8   :  { %4734 = vst [vmem:[#allocation80_spill] sm:$0xff] %v4207_v6 }
  0xc9   :  { %930 = vmatmul.bf16.vlgmr.msra.gmra.mxu0 %v3987_v53 }
  0xca   :  { %974 = vmatpush.bf16.xpose.msrb.mxu0 %v4157_v30  ;;  %943 = vmatmul.bf16.vlgmr.msra.gmra.mxu1 %v3989_v54 }
  0xcb   :  { %987 = vmatpush.bf16.xpose.msrb.mxu1 %v4159_v15  ;;  %956 = vmatmul.bf16.vlgmr.msra.gmra.mxu2 %v3987_v53  ;;  %v3563_v15 = vld [vmem:[#allocation3 + $0x334] sm:$0xf] }
  0xcc   :  { %1000 = vmatpush.bf16.xpose.msrb.mxu2 %v4161_v36  ;;  %1013 = vmatpush.bf16.xpose.msrb.mxu3 %v4164_v63  ;;  %v2857_v63 = vld [vmem:[#allocation3 + $0x348] sm:$0xf0]  ;;  %v4217_v17 = vor.u32 %v3563_v15, %v2849_v42  ;;  %v3578_v15 = vld [vmem:[#allocation3 + $0x3a4] sm:$0xf0] }
  0xcd   :  { %969 = vmatmul.bf16.vlgmr.msra.gmra.mxu3 %v3989_v54 }
  0xce   :  { %4737 = vst [vmem:[#allocation83_spill] sm:$0xff] %v4217_v17 }
  0xd0   :  { %v866_v42 = vpop.f32.mrf.mxu3 }
  0xd2   :  { %975 = vmatpush.bf16.xpose.msrb.mxu0 %v4173_v28 }
  0xd3   :  { %988 = vmatpush.bf16.xpose.msrb.mxu1 %v4176_v21  ;;  %v3565_v21 = vld [vmem:[#allocation3 + $0x344] sm:$0xf] }
  0xd4   :  { %1001 = vmatpush.bf16.xpose.msrb.mxu2 %v4178_v23  ;;  %1014 = vmatpush.bf16.xpose.msrb.mxu3 %v4182_v59  ;;  %v3566_v59 = vld [vmem:[#allocation3 + $0x344] sm:$0xf0]  ;;  %v4203_v7 = vor.u32 %v3565_v21, %v2857_v63  ;;  %v827_v63 = vpop.f32.mrf.mxu0  ;;  %v840_v21 = vpop.f32.mrf.mxu1 }
  0xd5   :  { %v4201_v61 = vor.u32 %v3566_v59, %v2855_v49  ;;  %v2911_v49 = vld [vmem:[#allocation3 + $0x3b0] sm:$0xf]  ;;  %v3580_v59 = vld [vmem:[#allocation3 + $0x3b4] sm:$0xf0]  ;;  %v4213_v19 = vadd.f32 %v840_v21, %v827_v63  ;;  %v2905_v63 = vld [vmem:[#allocation3 + $0x3a8] sm:$0xf0] }
  0xd6   :  { %4732 = vst [vmem:[#allocation78_spill] sm:$0xff] %v4203_v7 }
  0xd7   :  { %4731 = vst [vmem:[#allocation77_spill] sm:$0xff] %v4201_v61 }
  0xd8   :  { %4735 = vst [vmem:[#allocation81_spill] sm:$0xff] %v4213_v19 }
  0xda   :  { %976 = vmatpush.bf16.xpose.msrb.mxu0 %v4189_v0 }
  0xdb   :  { %989 = vmatpush.bf16.xpose.msrb.mxu1 %v4191_v14  ;;  %v3564_v14 = vld [vmem:[#allocation3 + $0x334] sm:$0xf0] }
  0xdc   :  { %1002 = vmatpush.bf16.xpose.msrb.mxu2 %v4193_v33  ;;  %1015 = vmatpush.bf16.xpose.msrb.mxu3 %v4195_v55  ;;  %v2847_v55 = vld [vmem:[#allocation3 + $0x330] sm:$0xf]  ;;  %v853_v33 = vpop.f32.mrf.mxu2 }
  0xdd   :  { %v4215_v11 = vor.u32 %v3564_v14, %v2847_v55  ;;  %v2841_v55 = vld [vmem:[#allocation3 + $0x328] sm:$0xf0]  ;;  %v2903_v14 = vld [vmem:[#allocation3 + $0x3a0] sm:$0xf]  ;;  %v4227_v21 = vadd.f32 %v866_v42, %v853_v33 }
  0xde   :  { %v4233_v19 = vor.u32 %v3578_v15, %v2903_v14  ;;  %v3575_v14 = vld [vmem:[#allocation3 + $0x394] sm:$0xf]  ;;  %v2897_v15 = vld [vmem:[#allocation3 + $0x398] sm:$0xf0] }
  0xdf   :  { %4736 = vst [vmem:[#allocation82_spill] sm:$0xff] %v4215_v11 }
  0xe2   :  { %977 = vmatpush.bf16.xpose.msrb.mxu0 %v4201_v61  ;;  %v3562_v61 = vld [vmem:[#allocation3 + $0x324] sm:$0xf0] }
  0xe3   :  { %990 = vmatpush.bf16.xpose.msrb.mxu1 %v4203_v7  ;;  %v4219_v7 = vor.u32 %v3580_v59, %v2911_v49  ;;  %v829_v49 = vpop.f32.mrf.mxu0  ;;  %v3577_v59 = vld [vmem:[#allocation3 + $0x3a4] sm:$0xf] }
  0xe4   :  { %1003 = vmatpush.bf16.xpose.msrb.mxu2 %v4205_v27  ;;  %1016 = vmatpush.bf16.xpose.msrb.mxu3 %v4207_v6  ;;  %v4221_v27 = vor.u32 %v3579_v57, %v2913_v45  ;;  %v2839_v6 = vld [vmem:[#allocation3 + $0x320] sm:$0xf]  ;;  %v842_v57 = vpop.f32.mrf.mxu1  ;;  %v2831_v49 = vld [vmem:[#allocation3 + $0x310] sm:$0xf]  ;;  %v855_v33 = vpop.f32.mrf.mxu2 }
  0xe5   :  { %4738 = vst [vmem:[#allocation84_spill] sm:$0xff] %v4219_v7  ;;  %v4229_v45 = vor.u32 %v3562_v61, %v2839_v6  ;;  %v2833_v61 = vld [vmem:[#allocation3 + $0x318] sm:$0xf0]  ;;  %v2895_v6 = vld [vmem:[#allocation3 + $0x390] sm:$0xf]  ;;  %v4247_v57 = vor.u32 %v3575_v14, %v2897_v15 }
  0xe6   :  { %4739 = vst [vmem:[#allocation85_spill] sm:$0xff] %v4221_v27  ;;  %v2823_v33 = vld [vmem:[#allocation3 + $0x300] sm:$0xf] }
  0xea   :  { %978 = vmatpush.bf16.xpose.msrb.mxu0 %v4215_v11  ;;  %v3559_v11 = vld [vmem:[#allocation3 + $0x314] sm:$0xf] }
  0xeb   :  { %991 = vmatpush.bf16.xpose.msrb.mxu1 %v4217_v17  ;;  %v4231_v17 = vor.u32 %v3561_v12, %v2841_v55  ;;  %v3576_v12 = vld [vmem:[#allocation3 + $0x394] sm:$0xf0]  ;;  %v868_v55 = vpop.f32.mrf.mxu3 }
  0xec   :  { %1004 = vmatpush.bf16.xpose.msrb.mxu2 %v4219_v7  ;;  %1017 = vmatpush.bf16.xpose.msrb.mxu3 %v4221_v27  ;;  %v4235_v7 = vor.u32 %v3577_v59, %v2905_v63  ;;  %v3560_v27 = vld [vmem:[#allocation3 + $0x314] sm:$0xf0]  ;;  %v4243_v59 = vor.u32 %v3559_v11, %v2833_v61  ;;  %v4245_v63 = vor.u32 %v3576_v12, %v2895_v6  ;;  %v2825_v55 = vld [vmem:[#allocation3 + $0x308] sm:$0xf0]  ;;  %v3573_v11 = vld [vmem:[#allocation3 + $0x384] sm:$0xf] }
  0xed   :  { %4740 = vst [vmem:[#allocation86_spill] sm:$0xff] %v4231_v17  ;;  %v4241_v42 = vor.u32 %v3560_v27, %v2831_v49  ;;  %v2887_v27 = vld [vmem:[#allocation3 + $0x380] sm:$0xf]  ;;  %v3574_v49 = vld [vmem:[#allocation3 + $0x384] sm:$0xf0] }
  0xee   :  { %4741 = vst [vmem:[#allocation87_spill] sm:$0xff] %v4235_v7  ;;  %v2889_v61 = vld [vmem:[#allocation3 + $0x388] sm:$0xf0]  ;;  %v4257_v14 = vor.u32 %v3574_v49, %v2887_v27 }
  0xef   :  { %v4259_v15 = vor.u32 %v3573_v11, %v2889_v61 }
  0xf2   :  { %979 = vmatpush.bf16.xpose.msrb.mxu0 %v4229_v45 }
  0xf3   :  { %992 = vmatpush.bf16.xpose.msrb.mxu1 %v4231_v17  ;;  %v3557_v17 = vld [vmem:[#allocation3 + $0x304] sm:$0xf] }
  0xf4   :  { %1005 = vmatpush.bf16.xpose.msrb.mxu2 %v4233_v19  ;;  %1018 = vmatpush.bf16.xpose.msrb.mxu3 %v4235_v7  ;;  %v3558_v7 = vld [vmem:[#allocation3 + $0x304] sm:$0xf0]  ;;  %v4255_v12 = vor.u32 %v3557_v17, %v2825_v55 }
  0xf5   :  { %v4253_v6 = vor.u32 %v3558_v7, %v2823_v33 }
  0xfa   :  { %980 = vmatpush.bf16.xpose.msrb.mxu0 %v4241_v42 }
  0xfb   :  { %993 = vmatpush.bf16.xpose.msrb.mxu1 %v4243_v59 }
  0xfc   :  { %1006 = vmatpush.bf16.xpose.msrb.mxu2 %v4245_v63  ;;  %1019 = vmatpush.bf16.xpose.msrb.mxu3 %v4247_v57 }
 0x102   :  { %981 = vmatpush.bf16.xpose.msrb.mxu0 %v4253_v6 }
 0x103   :  { %994 = vmatpush.bf16.xpose.msrb.mxu1 %v4255_v12 }
 0x104   :  { %1007 = vmatpush.bf16.xpose.msrb.mxu2 %v4257_v14  ;;  %1020 = vmatpush.bf16.xpose.msrb.mxu3 %v4259_v15 }
 0x109   :  { %982 = vmatmul.bf16.vlgmr.msrb.gmra.mxu0 %v3987_v53 }
 0x10a   :  { %1095 = vmatpush.bf16.msra.mxu0 %v3858_v3  ;;  %995 = vmatmul.bf16.vlgmr.msrb.gmra.mxu1 %v3989_v54  ;;  %v879_v3 = vpop.f32.mrf.mxu0 }
 0x10b   :  { %1108 = vmatpush.bf16.msra.mxu1 %v3862_v8  ;;  %1008 = vmatmul.bf16.vlgmr.msrb.gmra.mxu2 %v3987_v53  ;;  %v892_v8 = vpop.f32.mrf.mxu1  ;;  %v4755_v53 = vld [vmem:[#allocation66_spill] sm:$0xff] }
 0x10c   :  { %1121 = vmatpush.bf16.msra.mxu2 %v3950_v60  ;;  %1134 = vmatpush.bf16.msra.mxu3 %v3954_v62  ;;  %v4749_v60 = vld [vmem:[#allocation82_spill] sm:$0xff]  ;;  %v4750_v62 = vld [vmem:[#allocation84_spill] sm:$0xff] }
 0x10d   :  { %1021 = vmatmul.bf16.vlgmr.msrb.gmra.mxu3 %v3989_v54  ;;  %v4756_v54 = vld [vmem:[#allocation68_spill] sm:$0xff] }
 0x10e   :  { %1096 = vmatpush.bf16.msra.mxu0 %v3870_v20  ;;  %v4284_v20 = vadd.f32 %v892_v8, %v879_v3 }
 0x10f   :  { %1109 = vmatpush.bf16.msra.mxu1 %v3874_v22  ;;  %v905_v22 = vpop.f32.mrf.mxu2 }
 0x110   :  { %1122 = vmatpush.bf16.msra.mxu2 %v3966_v16  ;;  %1135 = vmatpush.bf16.msra.mxu3 %v3970_v18  ;;  %v4751_v16 = vld [vmem:[#allocation58_spill] sm:$0xff]  ;;  %v4752_v18 = vld [vmem:[#allocation60_spill] sm:$0xff] }
 0x112   :  { %1097 = vmatpush.bf16.msra.mxu0 %v3882_v32  ;;  %v918_v32 = vpop.f32.mrf.mxu3 }
 0x113   :  { %1110 = vmatpush.bf16.msra.mxu1 %v3886_v34  ;;  %v881_v34 = vpop.f32.mrf.mxu0 }
 0x114   :  { %1123 = vmatpush.bf16.msra.mxu2 %v3981_v48  ;;  %1136 = vmatpush.bf16.msra.mxu3 %v3985_v50  ;;  %v4753_v48 = vld [vmem:[#allocation62_spill] sm:$0xff]  ;;  %v4754_v50 = vld [vmem:[#allocation64_spill] sm:$0xff] }
 0x116   :  { %1098 = vmatpush.bf16.msra.mxu0 %v3894_v44  ;;  %v4293_v44 = vadd.f32 %v918_v32, %v905_v22 }
 0x117   :  { %1111 = vmatpush.bf16.msra.mxu1 %v3898_v46  ;;  %v894_v46 = vpop.f32.mrf.mxu1 }
 0x118   :  { %1124 = vmatpush.bf16.msra.mxu2 %v4001_v29  ;;  %1137 = vmatpush.bf16.msra.mxu3 %v4005_v31 }
 0x11a   :  { %1099 = vmatpush.bf16.msra.mxu0 %v3906_v56  ;;  %v907_v56 = vpop.f32.mrf.mxu2 }
 0x11b   :  { %1112 = vmatpush.bf16.msra.mxu1 %v3910_v58  ;;  %v920_v58 = vpop.f32.mrf.mxu3 }
 0x11c   :  { %1125 = vmatpush.bf16.msra.mxu2 %v4013_v4  ;;  %1138 = vmatpush.bf16.msra.mxu3 %v4017_v13 }
 0x11e   :  { %1100 = vmatpush.bf16.msra.mxu0 %v3918_v5  ;;  %v4743_v5 = vld [vmem:[#allocation50_spill] sm:$0xff] }
 0x11f   :  { %1113 = vmatpush.bf16.msra.mxu1 %v3922_v9  ;;  %v4744_v9 = vld [vmem:[#allocation52_spill] sm:$0xff] }
 0x120   :  { %1126 = vmatpush.bf16.msra.mxu2 %v4025_v41  ;;  %1139 = vmatpush.bf16.msra.mxu3 %v4029_v1 }
 0x122   :  { %1101 = vmatpush.bf16.msra.mxu0 %v3930_v24  ;;  %v4745_v24 = vld [vmem:[#allocation77_spill] sm:$0xff] }
 0x123   :  { %1114 = vmatpush.bf16.msra.mxu1 %v3934_v26  ;;  %v4746_v26 = vld [vmem:[#allocation79_spill] sm:$0xff] }
 0x124   :  { %1127 = vmatpush.bf16.msra.mxu2 %v4037_v37  ;;  %1140 = vmatpush.bf16.msra.mxu3 %v4041_v39  ;;  %v4757_v39 = vld [vmem:[#allocation81_spill] sm:$0xff] }
 0x126   :  { %1102 = vmatpush.bf16.msra.mxu0 %v3942_v43  ;;  %v4747_v43 = vld [vmem:[#allocation54_spill] sm:$0xff] }
 0x127   :  { %1115 = vmatpush.bf16.msra.mxu1 %v3946_v52  ;;  %v4748_v52 = vld [vmem:[#allocation56_spill] sm:$0xff] }
 0x128   :  { %1128 = vmatpush.bf16.msra.mxu2 %v4049_v51  ;;  %1141 = vmatpush.bf16.msra.mxu3 %v4053_v38  ;;  %v1027_v51 = vmul.f32 %v4227_v21, %v4227_v21 }
 0x12a   :  { %1147 = vmatpush.bf16.msrb.mxu0 %v4057_v40  ;;  %v1026_v40 = vmul.f32 %v4757_v39, %v4757_v39 }
 0x12b   :  { %1160 = vmatpush.bf16.msrb.mxu1 %v4061_v35  ;;  %v4742_v35 = vld [vmem:[#allocation75_spill] sm:$0xff] }
 0x12c   :  { %1173 = vmatpush.bf16.msrb.mxu2 %v4157_v30  ;;  %1186 = vmatpush.bf16.msrb.mxu3 %v4161_v36  ;;  %v1029_v36 = vmul.f32 %v4293_v44, %v4293_v44 }
 0x12e   :  { %1148 = vmatpush.bf16.msrb.mxu0 %v4073_v25  ;;  %v1035_v25 = vsel %vm1034_vm0, %v1026_v40, 0.0 }
 0x12f   :  { %1161 = vmatpush.bf16.msrb.mxu1 %v4078_v10  ;;  %v1036_v10 = vsel %vm1034_vm0, %v1027_v51, 0.0 }
 0x130   :  { %1174 = vmatpush.bf16.msrb.mxu2 %v4173_v28  ;;  %1187 = vmatpush.bf16.msrb.mxu3 %v4178_v23  ;;  %v1037_v17 = vadd.f32 %v1036_v10, %v1035_v25 }
 0x132   :  { %1149 = vmatpush.bf16.msrb.mxu0 %v4089_v47  ;;  %v1028_v47 = vmul.f32 %v4284_v20, %v4284_v20 }
 0x133   :  { %1162 = vmatpush.bf16.msrb.mxu1 %v4093_v2 }
 0x134   :  { %1175 = vmatpush.bf16.msrb.mxu2 %v4189_v0  ;;  %1188 = vmatpush.bf16.msrb.mxu3 %v4742_v35  ;;  %v1038_v23 = vsel %vm1034_vm0, %v1028_v47, 0.0 }
 0x136   :  { %1150 = vmatpush.bf16.msrb.mxu0 %v4743_v5 }
 0x137   :  { %1163 = vmatpush.bf16.msrb.mxu1 %v4744_v9 }
 0x138   :  { %1176 = vmatpush.bf16.msrb.mxu2 %v4745_v24  ;;  %1189 = vmatpush.bf16.msrb.mxu3 %v4746_v26 }
 0x13a   :  { %1151 = vmatpush.bf16.msrb.mxu0 %v4747_v43 }
 0x13b   :  { %1164 = vmatpush.bf16.msrb.mxu1 %v4748_v52 }
 0x13c   :  { %1177 = vmatpush.bf16.msrb.mxu2 %v4749_v60  ;;  %1190 = vmatpush.bf16.msrb.mxu3 %v4750_v62 }
 0x13e   :  { %1152 = vmatpush.bf16.msrb.mxu0 %v4751_v16 }
 0x13f   :  { %1165 = vmatpush.bf16.msrb.mxu1 %v4752_v18 }
 0x140   :  { %1178 = vmatpush.bf16.msrb.mxu2 %v4229_v45  ;;  %1191 = vmatpush.bf16.msrb.mxu3 %v4233_v19  ;;  %v1040_v45 = vsel %vm1034_vm0, %v1029_v36, 0.0 }
 0x142   :  { %1153 = vmatpush.bf16.msrb.mxu0 %v4753_v48 }
 0x143   :  { %1166 = vmatpush.bf16.msrb.mxu1 %v4754_v50 }
 0x144   :  { %1179 = vmatpush.bf16.msrb.mxu2 %v4241_v42  ;;  %1192 = vmatpush.bf16.msrb.mxu3 %v4245_v63  ;;  %v1039_v63 = vadd.f32 %v1038_v23, %v1037_v17 }
 0x146   :  { %1154 = vmatpush.bf16.msrb.mxu0 %v4755_v53  ;;  %v931_v29 = vpop.f32.mrf.mxu0  ;;  %v1041_v27 = vadd.f32 %v1040_v45, %v1039_v63 }
 0x147   :  { %1167 = vmatpush.bf16.msrb.mxu1 %v4756_v54  ;;  %v944_v31 = vpop.f32.mrf.mxu1 }
 0x148   :  { %1180 = vmatpush.bf16.msrb.mxu2 %v4253_v6  ;;  %1193 = vmatpush.bf16.msrb.mxu3 %v4257_v14  ;;  %v4345_v2 = vadd.f32 %v944_v31, %v931_v29 }
 0x14a   :  { %v1030_v0 = vmul.f32 %v4345_v2, %v4345_v2 }
 0x14c   :  { %v1042_v33 = vsel %vm1034_vm0, %v1030_v0, 0.0 }
 0x14d   :  { %v1043_v61 = vadd.f32 %v1042_v33, %v1041_v27  ;;  %v4758_v33 = vld [vmem:[#allocation12_spill] sm:$0xff] }
 0x14e   :  { %v957_v4 = vpop.f32.mrf.mxu2  ;;  %v933_v41 = vpop.f32.mrf.mxu0 }
 0x14f   :  { %v946_v1 = vpop.f32.mrf.mxu1 }
 0x150   :  { %v970_v13 = vpop.f32.mrf.mxu3 }
 0x151   :  { %v4349_v30 = vadd.f32 %v970_v13, %v957_v4 }
 0x153   :  { %v1031_v42 = vmul.f32 %v4349_v30, %v4349_v30 }
 0x155   :  { %v1044_v49 = vsel %vm1034_vm0, %v1031_v42, 0.0 }
 0x156   :  { %v959_v37 = vpop.f32.mrf.mxu2  ;;  %v1045_v32 = vadd.f32 %v1044_v49, %v1043_v61  ;;  %v4761_v61 = vld [vmem:[#allocation29_spill] sm:$0xff] }
 0x158   :  { %v972_v38 = vpop.f32.mrf.mxu3 }
 0x186   :  { %v983_v28 = vpop.f32.mrf.mxu0 }
 0x187   :  { %v996_v7 = vpop.f32.mrf.mxu1 }
 0x188   :  { %v997_v19 = vadd.f32 %v996_v7, %v983_v28 }
 0x18a   :  { %v1032_v55 = vmul.f32 %v997_v19, %v997_v19 }
 0x18c   :  { %v1046_v22 = vsel %vm1034_vm0, %v1032_v55, 0.0  ;;  %v4759_v55 = vld [vmem:[#allocation13_spill] sm:$0xff] }
 0x18d   :  { %v1047_v46 = vadd.f32 %v1046_v22, %v1045_v32  ;;  %v4762_v22 = vld [vmem:[#allocation14_spill] sm:$0xff]  ;;  %v4763_v32 = vld [vmem:[#allocation15_spill] sm:$0xff] }
 0x18e   :  { %v1009_v11 = vpop.f32.mrf.mxu2  ;;  %v985_v14 = vpop.f32.mrf.mxu0 }
 0x18f   :  { %v998_v8 = vpop.f32.mrf.mxu1 }
 0x190   :  { %v1022_v6 = vpop.f32.mrf.mxu3 }
 0x191   :  { %v1023_v3 = vadd.f32 %v1022_v6, %v1009_v11  ;;  %v4760_v11 = vld [vmem:[#allocation28_spill] sm:$0xff] }
 0x193   :  { %v1033_v34 = vmul.f32 %v1023_v3, %v1023_v3 }
 0x195   :  { %v1048_v56 = vsel %vm1034_vm0, %v1033_v34, 0.0  ;;  %v4764_v34 = vld [vmem:[#allocation30_spill] sm:$0xff] }
 0x196   :  { %v1049_v58 = vadd.f32 %v1048_v56, %v1047_v46  ;;  %v1011_v35 = vpop.f32.mrf.mxu2  ;;  %v4765_v46 = vld [vmem:[#allocation31_spill] sm:$0xff]  ;;  %v4766_v56 = vld [vmem:[#allocation16_spill] sm:$0xff] }
 0x197   :  { %v4768_v35 = vld [vmem:[#allocation32_spill] sm:$0xff] }
 0x198   :  { %v1024_v5 = vpop.f32.mrf.mxu3  ;;  %1050 = vadd.xlane.f32.xlu0 %v1049_v58  ;;  %v4767_v58 = vld [vmem:[#allocation17_spill] sm:$0xff] }
 0x199   :  { %v4769_v5 = vld [vmem:[#allocation33_spill] sm:$0xff] }
 0x20b   :  { %v1051_v9 = vpop.xlane.xlu0 %1050 }
 0x20c   :  { %3726 = vrsqrt.f32 %v1051_v9  ;;  %vm1059_vm1 = vcmp.eq.f32.partialorder %v1051_v9, inf  ;;  %v1062_v18 = vand.u32 2147483648, %v1051_v9  ;;  %vm1061_vm2 = vcmp.eq.f32.partialorder %v1051_v9, 0.0 }
 0x212   :  { %v3727_v24 = vpop.eup %3726 }
 0x213   :  { %v1053_v26 = vmul.f32 %v3727_v24, %v1051_v9 }
 0x215   :  { %v1054_v43 = vmul.f32 %v3727_v24, %v1053_v26 }
 0x217   :  { %v1055_v52 = vmul.f32 0.5, %v1054_v43 }
 0x219   :  { %v1056_v60 = vsub.f32 1.5, %v1055_v52  ;;  %v4772_v52 = vld [vmem:[#allocation34_spill] sm:$0xff] }
 0x21b   :  { %v1057_v62 = vmul.f32 %v3727_v24, %v1056_v60  ;;  %v4771_v24 = vld [vmem:[#allocation19_spill] sm:$0xff] }
 0x21c   :  { %v4773_v60 = vld [vmem:[#allocation35_spill] sm:$0xff] }
 0x21d   :  { %v1058_v16 = vmul.f32 %v1057_v62, %v1051_v9 }
 0x21f   :  { %v1060_v48 = vsel %vm1059_vm1, %v1051_v9, %v1058_v16  ;;  %v4770_v9 = vld [vmem:[#allocation18_spill] sm:$0xff] }
 0x220   :  { %v1063_v50 = vsel %vm1061_vm2, %v1062_v18, %v1060_v48  ;;  %v4774_v18 = vld [vmem:[#allocation20_spill] sm:$0xff]  ;;  %v4775_v48 = vld [vmem:[#allocation21_spill] sm:$0xff] }
 0x221   :  { %v1064_v53 = vadd.f32 1e-12, %v1063_v50  ;;  %v4776_v50 = vld [vmem:[#allocation36_spill] sm:$0xff] }
 0x223   :  { %3728 = vrcp.f32 %v1064_v53  ;;  %v1076_v4 = vand.u32 2147483648, %v1064_v53  ;;  %v1074_v41 = vand.u32 2147483647, %v1064_v53  ;;  %vm1070_vm4 = vweird.f32 %v1064_v53 }
 0x225   :  { %v1077_v37 = vor.u32 1.1754944e-38, %v1076_v4  ;;  %vm1075_vm6 = vcmp.eq.f32.partialorder %v1074_v41, 8.507059e+37  ;;  %v4781_v4 = vld [vmem:[#allocation39_spill] sm:$0xff]  ;;  %v4783_v41 = vld [vmem:[#allocation25_spill] sm:$0xff] }
 0x229   :  { %v3729_v54 = vpop.eup %3728 }
 0x22a   :  { %v1066_v29 = vmul.f32 %v3729_v54, %v1064_v53  ;;  %vm1071_vm3 = vweird.f32 %v3729_v54  ;;  %v4777_v53 = vld [vmem:[#allocation37_spill] sm:$0xff] }
 0x22b   :  { %vm1072_vm5 = vmor %vm1070_vm4, %vm1071_vm3 }
 0x22c   :  { %v1067_v31 = vsub.f32 1.0, %v1066_v29  ;;  %v4779_v29 = vld [vmem:[#allocation23_spill] sm:$0xff] }
 0x22e   :  { %v1068_v13 = vmul.f32 %v3729_v54, %v1067_v31  ;;  %v4780_v31 = vld [vmem:[#allocation38_spill] sm:$0xff] }
 0x230   :  { %v1069_v1 = vadd.f32 %v3729_v54, %v1068_v13  ;;  %v4782_v13 = vld [vmem:[#allocation24_spill] sm:$0xff] }
 0x232   :  { %v1073_v38 = vsel %vm1072_vm5, %v3729_v54, %v1069_v1  ;;  %v4778_v54 = vld [vmem:[#allocation22_spill] sm:$0xff]  ;;  %v4784_v1 = vld [vmem:[#allocation40_spill] sm:$0xff] }
 0x233   :  { %v1078_v40 = vsel %vm1075_vm6, %v1077_v37, %v1073_v38  ;;  %v4785_v37 = vld [vmem:[#allocation41_spill] sm:$0xff]  ;;  %v4786_v38 = vld [vmem:[#allocation26_spill] sm:$0xff] }
 0x234   :  { %v1079_v51 = vmul.f32 %v1078_v40, %v4757_v39  ;;  %v1080_v25 = vmul.f32 %v1078_v40, %v4227_v21  ;;  %v1081_v10 = vmul.f32 %v1078_v40, %v4284_v20  ;;  %v1082_v47 = vmul.f32 %v1078_v40, %v4293_v44 }
 0x235   :  { %v1083_v36 = vmul.f32 %v1078_v40, %v4345_v2  ;;  %v1084_v17 = vmul.f32 %v1078_v40, %v4349_v30  ;;  %v1085_v28 = vmul.f32 %v1078_v40, %v997_v19  ;;  %v1086_v23 = vmul.f32 %v1078_v40, %v1023_v3  ;;  %v4787_v40 = vld [vmem:[#allocation27_spill] sm:$0xff] }
 0x236   :  { %v4367_v0 = vpack.c.bf16 %v1079_v51, %v1079_v51  ;;  %v4369_v7 = vpack.c.bf16 %v1080_v25, %v1080_v25  ;;  %v1367_v45 = vrot.slane %v1080_v25, 7  ;;  %v4371_v42 = vpack.c.bf16 %v1081_v10, %v1081_v10  ;;  %v4789_v25 = vld [vmem:[#allocation43_spill] sm:$0xff] }
 0x237   :  { %v1368_v39 = vrot.slane %v1081_v10, 6  ;;  %v4373_v63 = vpack.c.bf16 %v1082_v47, %v1082_v47  ;;  %v1369_v21 = vrot.slane %v1082_v47, 5  ;;  %v1370_v20 = vrot.slane %v1083_v36, 4  ;;  %v4790_v10 = vld [vmem:[#allocation44_spill] sm:$0xff]  ;;  %v4791_v47 = vld [vmem:[#allocation45_spill] sm:$0xff] }
 0x238   :  { %1103 = vmatmul.bf16.vlgmr.msra.gmra.mxu0 %v4367_v0  ;;  %1116 = vmatmul.bf16.vlgmr.msra.gmra.mxu1 %v4369_v7  ;;  %v1371_v44 = vrot.slane %v1084_v17, 3  ;;  %v1372_v2 = vrot.slane %v1085_v28, 2  ;;  %v1373_v30 = vrot.slane %v1086_v23, 1  ;;  %v1374_v19 = vsel %vm1034_vm0, %v1079_v51, %v1367_v45  ;;  %v4788_v51 = vld [vmem:[#allocation42_spill] sm:$0xff]  ;;  %v4796_v45 = vld [vmem:[#allocation72_spill] sm:$0xff] }
 0x239   :  { %1129 = vmatmul.bf16.vlgmr.msra.gmra.mxu2 %v4371_v42  ;;  %1142 = vmatmul.bf16.vlgmr.msra.gmra.mxu3 %v4373_v63  ;;  %v1376_v27 = vsel %vm1375_vm7, %v1368_v39, %v1369_v21  ;;  %v1091_v26 = vpack.c.bf16 %v1083_v36, %v1083_v36  ;;  %v1092_v43 = vpack.c.bf16 %v1084_v17, %v1084_v17  ;;  %v4792_v36 = vld [vmem:[#allocation70_spill] sm:$0xff]  ;;  %v4793_v17 = vld [vmem:[#allocation71_spill] sm:$0xff]  ;;  %v4797_v39 = vld [vmem:[#allocation73_spill] sm:$0xff] }
 0x23a   :  { %1199 = vmatpush.bf16.msra.mxu0 %v4758_v33  ;;  %1212 = vmatpush.bf16.msra.mxu1 %v4759_v55  ;;  %v1380_v49 = vsel %vm1379_vm8, %v1370_v20, %v1371_v44  ;;  %v1378_v6 = vsel %vm1377_vm9, %v1374_v19, %v1376_v27  ;;  %v1382_v14 = vsel %vm1381_vm10, %v1372_v2, %v1373_v30  ;;  %v4798_v21 = vld [vmem:[#allocation48_spill] sm:$0xff]  ;;  %v4799_v20 = vld [vmem:[#allocation49_spill] sm:$0xff]  ;;  %v4800_v44 = vld [vmem:[#allocation74_spill] sm:$0xff] }
 0x23b   :  { %1225 = vmatpush.bf16.msra.mxu2 %v4760_v11  ;;  %1238 = vmatpush.bf16.msra.mxu3 %v4761_v61  ;;  %v1384_v3 = vsel %vm1383_vm11, %v1380_v49, %v1382_v14  ;;  %v1093_v62 = vpack.c.bf16 %v1085_v28, %v1085_v28  ;;  %v1094_v16 = vpack.c.bf16 %v1086_v23, %v1086_v23  ;;  %v4794_v28 = vld [vmem:[#allocation46_spill] sm:$0xff]  ;;  %v4795_v23 = vld [vmem:[#allocation47_spill] sm:$0xff]  ;;  %v4805_v2 = vld [vmem:[#allocation80_spill] sm:$0xff] }
 0x23c   :  { %v1386_v8 = vsel %vm1385_vm12, %v1378_v6, %v1384_v3  ;;  %v4806_v30 = vld [vmem:[#allocation55_spill] sm:$0xff]  ;;  %v4807_v19 = vld [vmem:[#allocation57_spill] sm:$0xff]  ;;  %v4812_v11 = vld [vmem:[#allocation86_spill] sm:$0xff] }
 0x23d   :  { %1388 = vst [vmem:[#allocation7] sm:$0xff] %v1386_v8  ;;  %v4808_v33 = vld [vmem:[#allocation83_spill] sm:$0xff]  ;;  %v4809_v55 = vld [vmem:[#allocation85_spill] sm:$0xff] }
 0x23e   :  { %1200 = vmatpush.bf16.msra.mxu0 %v4762_v22  ;;  %1213 = vmatpush.bf16.msra.mxu1 %v4763_v32  ;;  %v4810_v27 = vld [vmem:[#allocation59_spill] sm:$0xff]  ;;  %v4811_v49 = vld [vmem:[#allocation61_spill] sm:$0xff]  ;;  %2423 = dma.vmem_to_hbm [thread:$0]  %s2419_s25, 128, %s2421_s1, [#allocation8]  }
 0x23f   :  { %1226 = vmatpush.bf16.msra.mxu2 %v4764_v34  ;;  %1239 = vmatpush.bf16.msra.mxu3 %v4765_v46  ;;  %v4813_v61 = vld [vmem:[#allocation87_spill] sm:$0xff]  ;;  %v4815_v14 = vld [vmem:[#allocation65_spill] sm:$0xff] }
 0x240   :  { %v4814_v6 = vld [vmem:[#allocation63_spill] sm:$0xff]  ;;  %v4817_v8 = vld [vmem:[#allocation69_spill] sm:$0xff] }
 0x241   :  { %v4816_v3 = vld [vmem:[#allocation67_spill] sm:$0xff] }
 0x242   :  { %1201 = vmatpush.bf16.msra.mxu0 %v4766_v56  ;;  %1214 = vmatpush.bf16.msra.mxu1 %v4767_v58 }
 0x243   :  { %1227 = vmatpush.bf16.msra.mxu2 %v4768_v35  ;;  %1240 = vmatpush.bf16.msra.mxu3 %v4769_v5 }
 0x246   :  { %1202 = vmatpush.bf16.msra.mxu0 %v4770_v9  ;;  %1215 = vmatpush.bf16.msra.mxu1 %v4771_v24 }
 0x247   :  { %1228 = vmatpush.bf16.msra.mxu2 %v4772_v52  ;;  %1241 = vmatpush.bf16.msra.mxu3 %v4773_v60 }
 0x248   :  { %1155 = vmatmul.bf16.vlgmr.msrb.gmra.mxu0 %v1091_v26  ;;  %1168 = vmatmul.bf16.vlgmr.msrb.gmra.mxu1 %v1092_v43 }
 0x249   :  { %1181 = vmatmul.bf16.vlgmr.msrb.gmra.mxu2 %v1093_v62  ;;  %1194 = vmatmul.bf16.vlgmr.msrb.gmra.mxu3 %v1094_v16 }
 0x24a   :  { %1203 = vmatpush.bf16.msra.mxu0 %v4774_v18  ;;  %1216 = vmatpush.bf16.msra.mxu1 %v4775_v48 }
 0x24b   :  { %1229 = vmatpush.bf16.msra.mxu2 %v4776_v50  ;;  %1242 = vmatpush.bf16.msra.mxu3 %v4777_v53 }
 0x24e   :  { %1204 = vmatpush.bf16.msra.mxu0 %v4778_v54  ;;  %1217 = vmatpush.bf16.msra.mxu1 %v4779_v29 }
 0x24f   :  { %1230 = vmatpush.bf16.msra.mxu2 %v4780_v31  ;;  %1243 = vmatpush.bf16.msra.mxu3 %v4781_v4 }
 0x252   :  { %1205 = vmatpush.bf16.msra.mxu0 %v4782_v13  ;;  %1218 = vmatpush.bf16.msra.mxu1 %v4783_v41 }
 0x253   :  { %1231 = vmatpush.bf16.msra.mxu2 %v4784_v1  ;;  %1244 = vmatpush.bf16.msra.mxu3 %v4785_v37 }
 0x256   :  { %1206 = vmatpush.bf16.msra.mxu0 %v4786_v38  ;;  %1219 = vmatpush.bf16.msra.mxu1 %v4787_v40 }
 0x257   :  { %1232 = vmatpush.bf16.msra.mxu2 %v4788_v51  ;;  %1245 = vmatpush.bf16.msra.mxu3 %v4789_v25 }
 0x259   :  { %1207 = vmatmul.bf16.vlgmr.msra.gmra.mxu0 %v4367_v0  ;;  %1220 = vmatmul.bf16.vlgmr.msra.gmra.mxu1 %v4369_v7  ;;  %v4801_v0 = vld [vmem:[#allocation76_spill] sm:$0xff]  ;;  %v4802_v7 = vld [vmem:[#allocation51_spill] sm:$0xff] }
 0x25a   :  { %1251 = vmatpush.bf16.msrb.mxu0 %v4790_v10  ;;  %1264 = vmatpush.bf16.msrb.mxu1 %v4791_v47 }
 0x25b   :  { %1277 = vmatpush.bf16.msrb.mxu2 %v4792_v36  ;;  %1290 = vmatpush.bf16.msrb.mxu3 %v4793_v17 }
 0x25c   :  { %1233 = vmatmul.bf16.vlgmr.msra.gmra.mxu2 %v4371_v42  ;;  %1246 = vmatmul.bf16.vlgmr.msra.gmra.mxu3 %v4373_v63  ;;  %v4803_v42 = vld [vmem:[#allocation53_spill] sm:$0xff]  ;;  %v4804_v63 = vld [vmem:[#allocation78_spill] sm:$0xff] }
 0x25e   :  { %1252 = vmatpush.bf16.msrb.mxu0 %v4794_v28  ;;  %1265 = vmatpush.bf16.msrb.mxu1 %v4795_v23 }
 0x25f   :  { %1278 = vmatpush.bf16.msrb.mxu2 %v4796_v45  ;;  %1291 = vmatpush.bf16.msrb.mxu3 %v4797_v39 }
 0x262   :  { %1253 = vmatpush.bf16.msrb.mxu0 %v4798_v21  ;;  %1266 = vmatpush.bf16.msrb.mxu1 %v4799_v20 }
 0x263   :  { %1279 = vmatpush.bf16.msrb.mxu2 %v4800_v44  ;;  %1292 = vmatpush.bf16.msrb.mxu3 %v4801_v0 }
 0x266   :  { %1254 = vmatpush.bf16.msrb.mxu0 %v4802_v7  ;;  %1267 = vmatpush.bf16.msrb.mxu1 %v4803_v42 }
 0x267   :  { %1280 = vmatpush.bf16.msrb.mxu2 %v4804_v63  ;;  %1293 = vmatpush.bf16.msrb.mxu3 %v4805_v2  ;;  %v3135_v2 = vld [vmem:[#allocation3 + $0x170] sm:$0xf] }
 0x26a   :  { %1255 = vmatpush.bf16.msrb.mxu0 %v4806_v30  ;;  %1268 = vmatpush.bf16.msrb.mxu1 %v4807_v19  ;;  %v3636_v30 = vld [vmem:[#allocation3 + $0x174] sm:$0xf0]  ;;  %v3007_v19 = vld [vmem:[#allocation3 + $0x70] sm:$0xf] }
 0x26b   :  { %1281 = vmatpush.bf16.msrb.mxu2 %v4808_v33  ;;  %1294 = vmatpush.bf16.msrb.mxu3 %v4809_v55  ;;  %v3136_v33 = vor.u32 %v3636_v30, %v3135_v2  ;;  %v3604_v55 = vld [vmem:[#allocation3 + $0x74] sm:$0xf0] }
 0x26c   :  { %v3644_v2 = vld [vmem:[#allocation3 + $0x1b4] sm:$0xf0] }
 0x26e   :  { %1256 = vmatpush.bf16.msrb.mxu0 %v4810_v27  ;;  %1269 = vmatpush.bf16.msrb.mxu1 %v4811_v49  ;;  %v3199_v27 = vld [vmem:[#allocation3 + $0x1f0] sm:$0xf]  ;;  %v3652_v49 = vld [vmem:[#allocation3 + $0x1f4] sm:$0xf0] }
 0x26f   :  { %1282 = vmatpush.bf16.msrb.mxu2 %v4812_v11  ;;  %1295 = vmatpush.bf16.msrb.mxu3 %v4813_v61  ;;  %v3008_v11 = vor.u32 %v3604_v55, %v3007_v19  ;;  %v3200_v61 = vor.u32 %v3652_v49, %v3199_v27  ;;  %v3612_v55 = vld [vmem:[#allocation3 + $0xb4] sm:$0xf0]  ;;  %v3095_v27 = vld [vmem:[#allocation3 + $0x120] sm:$0xf] }
 0x272   :  { %1257 = vmatpush.bf16.msrb.mxu0 %v4814_v6  ;;  %1270 = vmatpush.bf16.msrb.mxu1 %v4815_v14  ;;  %v3071_v6 = vld [vmem:[#allocation3 + $0xf0] sm:$0xf]  ;;  %v3620_v14 = vld [vmem:[#allocation3 + $0xf4] sm:$0xf0] }
 0x273   :  { %1283 = vmatpush.bf16.msrb.mxu2 %v4243_v59  ;;  %1296 = vmatpush.bf16.msrb.mxu3 %v4247_v57 }
 0x276   :  { %1258 = vmatpush.bf16.msrb.mxu0 %v4816_v3  ;;  %1271 = vmatpush.bf16.msrb.mxu1 %v4817_v8  ;;  %v3127_v3 = vld [vmem:[#allocation3 + $0x160] sm:$0xf]  ;;  %v3072_v8 = vor.u32 %v3620_v14, %v3071_v6  ;;  %v3594_v6 = vld [vmem:[#allocation3 + $0x24] sm:$0xf0] }
 0x277   :  { %1284 = vmatpush.bf16.msrb.mxu2 %v4255_v12  ;;  %1297 = vmatpush.bf16.msrb.mxu3 %v4259_v15 }
 0x279   :  { %1259 = vmatmul.bf16.vlgmr.msrb.gmra.mxu0 %v1091_v26  ;;  %1272 = vmatmul.bf16.vlgmr.msrb.gmra.mxu1 %v1092_v43 }
 0x27a   :  { %1285 = vmatmul.bf16.vlgmr.msrb.gmra.mxu2 %v1093_v62  ;;  %1298 = vmatmul.bf16.vlgmr.msrb.gmra.mxu3 %v1094_v16 }
 0x27b   :  { %2199 = vmatpush.bf16.msra.mxu2 %v3136_v33  ;;  %2173 = vmatpush.bf16.msra.mxu0 %v3008_v11  ;;  %v3039_v33 = vld [vmem:[#allocation3 + $0xb0] sm:$0xf]  ;;  %v3626_v11 = vld [vmem:[#allocation3 + $0x124] sm:$0xf0] }
 0x27c   :  { %2212 = vmatpush.bf16.msra.mxu3 %v3200_v61  ;;  %2186 = vmatpush.bf16.msra.mxu1 %v3072_v8  ;;  %v3040_v49 = vor.u32 %v3612_v55, %v3039_v33  ;;  %v2967_v61 = vld [vmem:[#allocation3 + $0x20] sm:$0xf] }
 0x27d   :  { %v2968_v8 = vor.u32 %v3594_v6, %v2967_v61  ;;  %v3447_v55 = vld [vmem:[#allocation3 + $0x3e0] sm:$0xf]  ;;  %v3682_v6 = vld [vmem:[#allocation3 + $0x2e4] sm:$0xf0] }
 0x2b5   :  { %v1104_v22 = vpop.f32.mrf.mxu0  ;;  %v1117_v32 = vpop.f32.mrf.mxu1 }
 0x2b6   :  { %v1118_v54 = vadd.f32 %v1117_v32, %v1104_v22  ;;  %v3634_v22 = vld [vmem:[#allocation3 + $0x164] sm:$0xf0]  ;;  %v2999_v32 = vld [vmem:[#allocation3 + $0x60] sm:$0xf] }
 0x2bc   :  { %v1130_v34 = vpop.f32.mrf.mxu2  ;;  %v1143_v46 = vpop.f32.mrf.mxu3 }
 0x2bd   :  { %v1106_v56 = vpop.f32.mrf.mxu0  ;;  %v1119_v59 = vpop.f32.mrf.mxu1  ;;  %v1131_v29 = vadd.f32 %v1130_v34, %v1118_v54  ;;  %v3602_v34 = vld [vmem:[#allocation3 + $0x64] sm:$0xf0] }
 0x2be   :  { %v3000_v56 = vor.u32 %v3602_v34, %v2999_v32  ;;  %v3191_v59 = vld [vmem:[#allocation3 + $0x1e0] sm:$0xf]  ;;  %v3630_v54 = vld [vmem:[#allocation3 + $0x144] sm:$0xf0] }
 0x2bf   :  { %v1144_v31 = vadd.f32 %v1143_v46, %v1131_v29  ;;  %v3128_v46 = vor.u32 %v3634_v22, %v3127_v3  ;;  %v3096_v3 = vor.u32 %v3626_v11, %v3095_v27  ;;  %v3159_v22 = vld [vmem:[#allocation3 + $0x1a0] sm:$0xf]  ;;  %v3642_v32 = vld [vmem:[#allocation3 + $0x1a4] sm:$0xf0] }
 0x2c0   :  { %2174 = vmatpush.bf16.msra.mxu0 %v3000_v56  ;;  %v3031_v34 = vld [vmem:[#allocation3 + $0xa0] sm:$0xf]  ;;  %v3610_v56 = vld [vmem:[#allocation3 + $0xa4] sm:$0xf0] }
 0x2c1   :  { %2200 = vmatpush.bf16.msra.mxu2 %v3128_v46  ;;  %v3160_v46 = vor.u32 %v3642_v32, %v3159_v22  ;;  %v3714_v27 = vld [vmem:[#allocation3 + $0x3e4] sm:$0xf0]  ;;  %v3247_v32 = vld [vmem:[#allocation3 + $0x250] sm:$0xf] }
 0x2c2   :  { %v3448_v61 = vor.u32 %v3714_v27, %v3447_v55  ;;  %v3706_v55 = vld [vmem:[#allocation3 + $0x3a4] sm:$0xf0] }
 0x2c4   :  { %v1132_v58 = vpop.f32.mrf.mxu2  ;;  %v1145_v57 = vpop.f32.mrf.mxu3 }
 0x2c5   :  { %v1156_v35 = vpop.f32.mrf.mxu0  ;;  %v1169_v5 = vpop.f32.mrf.mxu1  ;;  %v3650_v58 = vld [vmem:[#allocation3 + $0x1e4] sm:$0xf0]  ;;  %v3063_v57 = vld [vmem:[#allocation3 + $0xe0] sm:$0xf] }
 0x2c6   :  { %v1157_v13 = vadd.f32 %v1156_v35, %v1144_v31  ;;  %v3192_v35 = vor.u32 %v3650_v58, %v3191_v59  ;;  %v2983_v31 = vld [vmem:[#allocation3 + $0x40] sm:$0xf]  ;;  %v3087_v59 = vld [vmem:[#allocation3 + $0x110] sm:$0xf]  ;;  %v3624_v58 = vld [vmem:[#allocation3 + $0x114] sm:$0xf0] }
 0x2c8   :  { %v1170_v1 = vadd.f32 %v1169_v5, %v1157_v13  ;;  %v3618_v5 = vld [vmem:[#allocation3 + $0xe4] sm:$0xf0]  ;;  %2213 = vmatpush.bf16.msra.mxu3 %v3192_v35  ;;  %v3175_v13 = vld [vmem:[#allocation3 + $0x1c0] sm:$0xf]  ;;  %v3032_v35 = vor.u32 %v3610_v56, %v3031_v34  ;;  %v3664_v34 = vld [vmem:[#allocation3 + $0x254] sm:$0xf0] }
 0x2cc   :  { %v1182_v9 = vpop.f32.mrf.mxu2  ;;  %v1195_v24 = vpop.f32.mrf.mxu3 }
 0x2cd   :  { %v1158_v52 = vpop.f32.mrf.mxu0  ;;  %v1171_v12 = vpop.f32.mrf.mxu1  ;;  %v1183_v51 = vadd.f32 %v1182_v9, %v1170_v1  ;;  %v3119_v9 = vld [vmem:[#allocation3 + $0x150] sm:$0xf]  ;;  %v3047_v1 = vld [vmem:[#allocation3 + $0xc0] sm:$0xf] }
 0x2ce   :  { %v3064_v52 = vor.u32 %v3618_v5, %v3063_v57  ;;  %v2991_v12 = vld [vmem:[#allocation3 + $0x50] sm:$0xf]  ;;  %v3088_v5 = vor.u32 %v3624_v58, %v3087_v59  ;;  %v3712_v58 = vld [vmem:[#allocation3 + $0x3d4] sm:$0xf0] }
 0x2cf   :  { %v4450_v10 = vadd.f32 %v1195_v24, %v1183_v51  ;;  %v3632_v24 = vld [vmem:[#allocation3 + $0x154] sm:$0xf0]  ;;  %v3439_v59 = vld [vmem:[#allocation3 + $0x3d0] sm:$0xf] }
 0x2d0   :  { %2187 = vmatpush.bf16.msra.mxu1 %v3064_v52  ;;  %v3151_v52 = vld [vmem:[#allocation3 + $0x190] sm:$0xf] }
 0x2d1   :  { %v1303_v21 = vmul.f32 %v4450_v10, %v4450_v10 }
 0x2d3   :  { %v1305_v44 = vsel %vm1034_vm0, %v1303_v21, 0.0 }
 0x2d4   :  { %v1184_v60 = vpop.f32.mrf.mxu2  ;;  %v1197_v15 = vpop.f32.mrf.mxu3 }
 0x2d5   :  { %v3600_v60 = vld [vmem:[#allocation3 + $0x54] sm:$0xf0]  ;;  %v3183_v15 = vld [vmem:[#allocation3 + $0x1d0] sm:$0xf] }
 0x2d6   :  { %v1208_v26 = vpop.f32.mrf.mxu0  ;;  %v1221_v43 = vpop.f32.mrf.mxu1 }
 0x2d7   :  { %v1222_v4 = vadd.f32 %v1221_v43, %v1208_v26  ;;  %v3120_v26 = vor.u32 %v3632_v24, %v3119_v9  ;;  %v3648_v43 = vld [vmem:[#allocation3 + $0x1d4] sm:$0xf0]  ;;  %v2959_v9 = vld [vmem:[#allocation3 + $0x10] sm:$0xf] }
 0x2d8   :  { %v3592_v24 = vld [vmem:[#allocation3 + $0x14] sm:$0xf0] }
 0x2d9   :  { %2201 = vmatpush.bf16.msra.mxu2 %v3120_v26  ;;  %v3023_v26 = vld [vmem:[#allocation3 + $0x90] sm:$0xf] }
 0x2de   :  { %v1210_v18 = vpop.f32.mrf.mxu0  ;;  %v1223_v48 = vpop.f32.mrf.mxu1 }
 0x2df   :  { %v1234_v62 = vpop.f32.mrf.mxu2  ;;  %v1247_v16 = vpop.f32.mrf.mxu3  ;;  %v2992_v48 = vor.u32 %v3600_v60, %v2991_v12  ;;  %v2960_v60 = vor.u32 %v3592_v24, %v2959_v9  ;;  %v3680_v9 = vld [vmem:[#allocation3 + $0x2d4] sm:$0xf0]  ;;  %v3367_v24 = vld [vmem:[#allocation3 + $0x340] sm:$0xf] }
 0x2e0   :  { %v1235_v41 = vadd.f32 %v1234_v62, %v1222_v4  ;;  %v3055_v62 = vld [vmem:[#allocation3 + $0xd0] sm:$0xf]  ;;  %v3598_v4 = vld [vmem:[#allocation3 + $0x44] sm:$0xf0] }
 0x2e1   :  { %2175 = vmatpush.bf16.msra.mxu0 %v2992_v48  ;;  %v3079_v48 = vld [vmem:[#allocation3 + $0x100] sm:$0xf] }
 0x2e2   :  { %v1248_v37 = vadd.f32 %v1247_v16, %v1235_v41  ;;  %v3616_v16 = vld [vmem:[#allocation3 + $0xd4] sm:$0xf0]  ;;  %v3646_v41 = vld [vmem:[#allocation3 + $0x1c4] sm:$0xf0] }
 0x2e3   :  { %v3056_v29 = vor.u32 %v3616_v16, %v3055_v62  ;;  %v3176_v51 = vor.u32 %v3646_v41, %v3175_v13 }
 0x2e5   :  { %2188 = vmatpush.bf16.msra.mxu1 %v3056_v29  ;;  %v3700_v29 = vld [vmem:[#allocation3 + $0x374] sm:$0xf0] }
 0x2e7   :  { %v1236_v50 = vpop.f32.mrf.mxu2  ;;  %v1249_v53 = vpop.f32.mrf.mxu3 }
 0x2e8   :  { %v3184_v50 = vor.u32 %v3648_v43, %v3183_v15  ;;  %v3111_v53 = vld [vmem:[#allocation3 + $0x140] sm:$0xf]  ;;  %v3640_v15 = vld [vmem:[#allocation3 + $0x194] sm:$0xf0] }
 0x2e9   :  { %v3608_v43 = vld [vmem:[#allocation3 + $0x94] sm:$0xf0]  ;;  %v3152_v16 = vor.u32 %v3640_v15, %v3151_v52  ;;  %v3694_v15 = vld [vmem:[#allocation3 + $0x344] sm:$0xf0] }
 0x2ea   :  { %2214 = vmatpush.bf16.msra.mxu3 %v3184_v50  ;;  %v3622_v50 = vld [vmem:[#allocation3 + $0x104] sm:$0xf0] }
 0x2ee   :  { %2215 = vmatpush.bf16.msra.mxu3 %v3176_v51 }
 0x2f6   :  { %v1260_v38 = vpop.f32.mrf.mxu0  ;;  %v1273_v40 = vpop.f32.mrf.mxu1 }
 0x2f7   :  { %v1261_v25 = vadd.f32 %v1260_v38, %v1248_v37  ;;  %v3112_v37 = vor.u32 %v3630_v54, %v3111_v53  ;;  %v3614_v38 = vld [vmem:[#allocation3 + $0xc4] sm:$0xf0]  ;;  %v3024_v53 = vor.u32 %v3608_v43, %v3023_v26  ;;  %v3391_v54 = vld [vmem:[#allocation3 + $0x370] sm:$0xf]  ;;  %v3239_v26 = vld [vmem:[#allocation3 + $0x240] sm:$0xf] }
 0x2f8   :  { %v3392_v13 = vor.u32 %v3700_v29, %v3391_v54  ;;  %v3662_v43 = vld [vmem:[#allocation3 + $0x244] sm:$0xf0]  ;;  %v3368_v54 = vor.u32 %v3694_v15, %v3367_v24  ;;  %v3303_v29 = vld [vmem:[#allocation3 + $0x2c0] sm:$0xf] }
 0x2f9   :  { %v1274_v47 = vadd.f32 %v1273_v40, %v1261_v25  ;;  %v2984_v40 = vor.u32 %v3598_v4, %v2983_v31  ;;  %v3103_v25 = vld [vmem:[#allocation3 + $0x130] sm:$0xf]  ;;  %2202 = vmatpush.bf16.msra.mxu2 %v3112_v37  ;;  %v2951_v31 = vld [vmem:[#allocation3] sm:$0xf]  ;;  %v3590_v4 = vld [vmem:[#allocation3 + $0x4] sm:$0xf0] }
 0x2fa   :  { %v2952_v41 = vor.u32 %v3590_v4, %v2951_v31  ;;  %v3638_v37 = vld [vmem:[#allocation3 + $0x184] sm:$0xf0]  ;;  %v3240_v4 = vor.u32 %v3662_v43, %v3239_v26  ;;  %v3137_v26 = vld [vmem:[#allocation3 + $0x178] sm:$0xf0]  ;;  %v3207_v43 = vld [vmem:[#allocation3 + $0x200] sm:$0xf] }
 0x2fb   :  { %2176 = vmatpush.bf16.msra.mxu0 %v2984_v40  ;;  %v3678_v31 = vld [vmem:[#allocation3 + $0x2c4] sm:$0xf0] }
 0x2fc   :  { %v3686_v24 = vld [vmem:[#allocation3 + $0x304] sm:$0xf0] }
 0x2fd   :  { %v1286_v36 = vpop.f32.mrf.mxu2  ;;  %v1299_v17 = vpop.f32.mrf.mxu3 }
 0x2fe   :  { %v1287_v28 = vadd.f32 %v1286_v36, %v1274_v47  ;;  %v1262_v23 = vpop.f32.mrf.mxu0  ;;  %v1275_v45 = vpop.f32.mrf.mxu1  ;;  %v3628_v47 = vld [vmem:[#allocation3 + $0x134] sm:$0xf0]  ;;  %v3048_v36 = vor.u32 %v3614_v38, %v3047_v1  ;;  %v3143_v1 = vld [vmem:[#allocation3 + $0x180] sm:$0xf]  ;;  %v3263_v38 = vld [vmem:[#allocation3 + $0x270] sm:$0xf] }
 0x2ff   :  { %v3144_v51 = vor.u32 %v3638_v37, %v3143_v1 }
 0x300   :  { %v4452_v39 = vadd.f32 %v1299_v17, %v1287_v28  ;;  %v3104_v28 = vor.u32 %v3628_v47, %v3103_v25  ;;  %2189 = vmatpush.bf16.msra.mxu1 %v3048_v36  ;;  %v3668_v25 = vld [vmem:[#allocation3 + $0x274] sm:$0xf0]  ;;  %v3455_v47 = vld [vmem:[#allocation3 + $0x3f0] sm:$0xf] }
 0x301   :  { %v3264_v36 = vor.u32 %v3668_v25, %v3263_v38  ;;  %v3231_v38 = vld [vmem:[#allocation3 + $0x230] sm:$0xf] }
 0x302   :  { %v1304_v20 = vmul.f32 %v4452_v39, %v4452_v39  ;;  %2203 = vmatpush.bf16.msra.mxu2 %v3104_v28  ;;  %v3015_v28 = vld [vmem:[#allocation3 + $0x80] sm:$0xf] }
 0x304   :  { %v1306_v0 = vsel %vm1034_vm0, %v1304_v20, 0.0  ;;  %2190 = vmatpush.bf16.msra.mxu1 %v3040_v49  ;;  %v3319_v49 = vld [vmem:[#allocation3 + $0x2e0] sm:$0xf] }
 0x305   :  { %v1288_v7 = vpop.f32.mrf.mxu2  ;;  %v1301_v42 = vpop.f32.mrf.mxu3  ;;  %v1307_v63 = vadd.f32 %v1306_v0, %v1305_v44  ;;  %v2975_v44 = vld [vmem:[#allocation3 + $0x30] sm:$0xf]  ;;  %v3596_v0 = vld [vmem:[#allocation3 + $0x34] sm:$0xf0]  ;;  %v3320_v22 = vor.u32 %v3682_v6, %v3319_v49 }
 0x306   :  { %v2976_v42 = vor.u32 %v3596_v0, %v2975_v44  ;;  %2204 = vmatpush.bf16.msra.mxu2 %v3096_v3  ;;  %v3684_v44 = vld [vmem:[#allocation3 + $0x2f4] sm:$0xf0]  ;;  %v3383_v0 = vld [vmem:[#allocation3 + $0x360] sm:$0xf] }
 0x307   :  { %1308 = vadd.xlane.f32.xlu0 %v1307_v63  ;;  %v3167_v63 = vld [vmem:[#allocation3 + $0x1b0] sm:$0xf]  ;;  %v3696_v3 = vld [vmem:[#allocation3 + $0x354] sm:$0xf0] }
 0x308   :  { %v3168_v19 = vor.u32 %v3644_v2, %v3167_v63  ;;  %2177 = vmatpush.bf16.msra.mxu0 %v2976_v42  ;;  %2191 = vmatpush.bf16.msra.mxu1 %v3032_v35  ;;  %v3698_v42 = vld [vmem:[#allocation3 + $0x364] sm:$0xf0]  ;;  %v3255_v63 = vld [vmem:[#allocation3 + $0x260] sm:$0xf]  ;;  %v3248_v35 = vor.u32 %v3664_v34, %v3247_v32  ;;  %v3656_v34 = vld [vmem:[#allocation3 + $0x214] sm:$0xf0] }
 0x309   :  { %v3666_v2 = vld [vmem:[#allocation3 + $0x264] sm:$0xf0] }
 0x30a   :  { %2216 = vmatpush.bf16.msra.mxu3 %v3168_v19  ;;  %2205 = vmatpush.bf16.msra.mxu2 %v3088_v5  ;;  %v3384_v19 = vor.u32 %v3698_v42, %v3383_v0  ;;  %v3256_v33 = vor.u32 %v3666_v2, %v3255_v63  ;;  %v3311_v5 = vld [vmem:[#allocation3 + $0x2d0] sm:$0xf]  ;;  %v3223_v63 = vld [vmem:[#allocation3 + $0x220] sm:$0xf]  ;;  %v3658_v2 = vld [vmem:[#allocation3 + $0x224] sm:$0xf0] }
 0x30c   :  { %2178 = vmatpush.bf16.msra.mxu0 %v2968_v8  ;;  %2192 = vmatpush.bf16.msra.mxu1 %v3024_v53 }
 0x30e   :  { %2217 = vmatpush.bf16.msra.mxu3 %v3160_v46 }
 0x310   :  { %2179 = vmatpush.bf16.msra.mxu0 %v2960_v60  ;;  %v3440_v60 = vor.u32 %v3712_v58, %v3439_v59  ;;  %v3279_v58 = vld [vmem:[#allocation3 + $0x290] sm:$0xf] }
 0x312   :  { %2218 = vmatpush.bf16.msra.mxu3 %v3152_v16  ;;  %v3312_v16 = vor.u32 %v3680_v9, %v3311_v5  ;;  %v3335_v9 = vld [vmem:[#allocation3 + $0x300] sm:$0xf] }
 0x314   :  { %2180 = vmatpush.bf16.msra.mxu0 %v2952_v41  ;;  %v3692_v41 = vld [vmem:[#allocation3 + $0x334] sm:$0xf0] }
 0x316   :  { %2219 = vmatpush.bf16.msra.mxu3 %v3144_v51  ;;  %v3660_v51 = vld [vmem:[#allocation3 + $0x234] sm:$0xf0] }
 0x318   :  { %2225 = vmatpush.bf16.msrb.mxu0 %v3264_v36  ;;  %v3423_v36 = vld [vmem:[#allocation3 + $0x3b0] sm:$0xf] }
 0x31c   :  { %2226 = vmatpush.bf16.msrb.mxu0 %v3256_v33  ;;  %v3415_v33 = vld [vmem:[#allocation3 + $0x3a0] sm:$0xf] }
 0x31d   :  { %v3416_v32 = vor.u32 %v3706_v55, %v3415_v33  ;;  %v3065_v33 = vld [vmem:[#allocation3 + $0xe8] sm:$0xf0] }
 0x320   :  { %2227 = vmatpush.bf16.msrb.mxu0 %v3248_v35  ;;  %v1392_v35 = vld [vmem:[%s4583_s0 + $0x18] sm:$0xff] }
 0x324   :  { %2228 = vmatpush.bf16.msrb.mxu0 %v3240_v4  ;;  %v3651_v4 = vld [vmem:[#allocation3 + $0x1f4] sm:$0xf] }
 0x37a   :  { %v4460_v18 = vpop.xlane.xlu0 %1308 }
 0x37b   :  { %3730 = vrsqrt.f32 %v4460_v18  ;;  %vm1317_vm13 = vcmp.eq.f32.partialorder %v4460_v18, inf  ;;  %vm1319_vm14 = vcmp.eq.f32.partialorder %v4460_v18, 0.0  ;;  %v1320_v7 = vand.u32 2147483648, %v4460_v18 }
 0x381   :  { %v3731_v17 = vpop.eup %3730 }
 0x382   :  { %v1311_v23 = vmul.f32 %v3731_v17, %v4460_v18 }
 0x384   :  { %v1312_v45 = vmul.f32 %v3731_v17, %v1311_v23  ;;  %v3606_v23 = vld [vmem:[#allocation3 + $0x84] sm:$0xf0] }
 0x386   :  { %v1313_v21 = vmul.f32 0.5, %v1312_v45 }
 0x388   :  { %v1314_v20 = vsub.f32 1.5, %v1313_v21  ;;  %v3016_v21 = vor.u32 %v3606_v23, %v3015_v28 }
 0x38a   :  { %v1315_v30 = vmul.f32 %v3731_v17, %v1314_v20  ;;  %v3716_v17 = vld [vmem:[#allocation3 + $0x3f4] sm:$0xf0]  ;;  %v3327_v20 = vld [vmem:[#allocation3 + $0x2f0] sm:$0xf]  ;;  %2193 = vmatpush.bf16.msra.mxu1 %v3016_v21 }
 0x38b   :  { %v3456_v45 = vor.u32 %v3716_v17, %v3455_v47  ;;  %v3304_v47 = vor.u32 %v3678_v31, %v3303_v29  ;;  %v3708_v17 = vld [vmem:[#allocation3 + $0x3b4] sm:$0xf0]  ;;  %v3295_v21 = vld [vmem:[#allocation3 + $0x2b0] sm:$0xf]  ;;  %v3603_v31 = vld [vmem:[#allocation3 + $0x74] sm:$0xf] }
 0x38c   :  { %v1316_v14 = vmul.f32 %v1315_v30, %v4460_v18  ;;  %v3424_v42 = vor.u32 %v3708_v17, %v3423_v36  ;;  %v3619_v36 = vld [vmem:[#allocation3 + $0xf4] sm:$0xf]  ;;  %v3073_v17 = vld [vmem:[#allocation3 + $0xf8] sm:$0xf0] }
 0x38d   :  { %2264 = vmatpush.bf16.msrb.mxu3 %v3456_v45 }
 0x38e   :  { %v1318_v57 = vsel %vm1317_vm13, %v4460_v18, %v1316_v14  ;;  %v3080_v18 = vor.u32 %v3622_v50, %v3079_v48  ;;  %v3375_v14 = vld [vmem:[#allocation3 + $0x350] sm:$0xf]  ;;  %v3431_v48 = vld [vmem:[#allocation3 + $0x3c0] sm:$0xf]  ;;  %v3710_v50 = vld [vmem:[#allocation3 + $0x3c4] sm:$0xf0] }
 0x38f   :  { %v1321_v12 = vsel %vm1319_vm14, %v1320_v7, %v1318_v57  ;;  %v3328_v7 = vor.u32 %v3684_v44, %v3327_v20  ;;  %v3376_v56 = vor.u32 %v3696_v3, %v3375_v14  ;;  %v1391_v57 = vld [vmem:[%s4583_s0 + $0x10] sm:$0xff]  ;;  %v3432_v37 = vor.u32 %v3710_v50, %v3431_v48  ;;  %v3351_v20 = vld [vmem:[#allocation3 + $0x320] sm:$0xf]  ;;  %v3690_v44 = vld [vmem:[#allocation3 + $0x324] sm:$0xf0] }
 0x390   :  { %v4473_v62 = vadd.f32 1e-12, %v1321_v12  ;;  %2206 = vmatpush.bf16.msra.mxu2 %v3080_v18  ;;  %v4485_v52 = vpack.c.bf16 %v1391_v57, %v1391_v57  ;;  %v3224_v14 = vor.u32 %v3658_v2, %v3223_v63  ;;  %v3343_v3 = vld [vmem:[#allocation3 + $0x310] sm:$0xf]  ;;  %v3672_v57 = vld [vmem:[#allocation3 + $0x294] sm:$0xf0] }
 0x391   :  { %2238 = vmatpush.bf16.msrb.mxu1 %v3328_v7  ;;  %2265 = vmatpush.bf16.msrb.mxu3 %v3448_v61  ;;  %v3674_v61 = vld [vmem:[#allocation3 + $0x2a4] sm:$0xf0]  ;;  %v3399_v50 = vld [vmem:[#allocation3 + $0x380] sm:$0xf]  ;;  %v3280_v29 = vor.u32 %v3672_v57, %v3279_v58  ;;  %v3649_v63 = vld [vmem:[#allocation3 + $0x1e4] sm:$0xf] }
 0x392   :  { %3732 = vrcp.f32 %v4473_v62  ;;  %v1332_v40 = vand.u32 2147483647, %v4473_v62  ;;  %v1334_v8 = vand.u32 2147483648, %v4473_v62  ;;  %vm1328_vm1 = vweird.f32 %v4473_v62  ;;  %v3193_v2 = vld [vmem:[#allocation3 + $0x1e8] sm:$0xf0]  ;;  %v1396_v57 = vld [vmem:[%s4583_s0 + $0x38] sm:$0xff] }
 0x393   :  { %2207 = vmatmul.bf16.vlgmr.msra.gmra.mxu2 %v4485_v52 }
 0x394   :  { %2251 = vmatpush.bf16.msrb.mxu2 %v3392_v13  ;;  %v1335_v18 = vor.u32 1.1754944e-38, %v1334_v8  ;;  %v3359_v13 = vld [vmem:[#allocation3 + $0x330] sm:$0xf]  ;;  %vm1333_vm3 = vcmp.eq.f32.partialorder %v1332_v40, 8.507059e+37  ;;  %v3232_v40 = vor.u32 %v3660_v51, %v3231_v38  ;;  %v3688_v8 = vld [vmem:[#allocation3 + $0x314] sm:$0xf0] }
 0x395   :  { %2239 = vmatpush.bf16.msrb.mxu1 %v3320_v22  ;;  %2266 = vmatpush.bf16.msrb.mxu3 %v3440_v60  ;;  %v3360_v45 = vor.u32 %v3692_v41, %v3359_v13  ;;  %v3215_v22 = vld [vmem:[#allocation3 + $0x210] sm:$0xf]  ;;  %v3344_v5 = vor.u32 %v3688_v8, %v3343_v3  ;;  %v4518_v60 = vpack.c.bf16 %v1392_v35, %v1392_v35  ;;  %v3670_v38 = vld [vmem:[#allocation3 + $0x284] sm:$0xf0]  ;;  %v2993_v3 = vld [vmem:[#allocation3 + $0x58] sm:$0xf0] }
 0x396   :  { %2229 = vmatpush.bf16.msrb.mxu0 %v3232_v40  ;;  %v3216_v15 = vor.u32 %v3656_v34, %v3215_v22  ;;  %v3336_v41 = vor.u32 %v3686_v24, %v3335_v9  ;;  %v3633_v40 = vld [vmem:[#allocation3 + $0x164] sm:$0xf]  ;;  %v3647_v8 = vld [vmem:[#allocation3 + $0x1d4] sm:$0xf]  ;;  %v3113_v9 = vld [vmem:[#allocation3 + $0x148] sm:$0xf0] }
 0x397   :  { %2220 = vmatmul.bf16.vlgmr.msra.gmra.mxu3 %v4518_v60  ;;  %v1393_v34 = vld [vmem:[%s4583_s0 + $0x20] sm:$0xff]  ;;  %v1394_v24 = vld [vmem:[%s4583_s0 + $0x28] sm:$0xff] }
 0x398   :  { %v4477_v30 = vpop.eup %3732  ;;  %2252 = vmatpush.bf16.msrb.mxu2 %v3384_v19  ;;  %v4544_v58 = vpack.c.bf16 %v1393_v34, %v1393_v34 }
 0x399   :  { %v1324_v11 = vmul.f32 %v4477_v30, %v4473_v62  ;;  %vm1329_vm15 = vweird.f32 %v4477_v30  ;;  %2240 = vmatpush.bf16.msrb.mxu1 %v3312_v16  ;;  %v3676_v62 = vld [vmem:[#allocation3 + $0x2b4] sm:$0xf0]  ;;  %2267 = vmatpush.bf16.msrb.mxu3 %v3432_v37  ;;  %v3654_v16 = vld [vmem:[#allocation3 + $0x204] sm:$0xf0]  ;;  %v3271_v37 = vld [vmem:[#allocation3 + $0x280] sm:$0xf] }
 0x39a   :  { %vm1330_vm2 = vmor %vm1328_vm1, %vm1329_vm15  ;;  %v3296_v19 = vor.u32 %v3676_v62, %v3295_v21  ;;  %2230 = vmatpush.bf16.msrb.mxu0 %v3224_v14  ;;  %v3599_v14 = vld [vmem:[#allocation3 + $0x54] sm:$0xf] }
 0x39b   :  { %v1325_v46 = vsub.f32 1.0, %v1324_v11  ;;  %v3287_v11 = vld [vmem:[#allocation3 + $0x2a0] sm:$0xf]  ;;  %v2996_v35 = vor.u32 %v3599_v14, %v2993_v3  ;;  %v3607_v14 = vld [vmem:[#allocation3 + $0x94] sm:$0xf] }
 0x39c   :  { %2253 = vmatpush.bf16.msrb.mxu2 %v3376_v56  ;;  %v3704_v56 = vld [vmem:[#allocation3 + $0x394] sm:$0xf0]  ;;  %v3288_v59 = vor.u32 %v3674_v61, %v3287_v11  ;;  %v3121_v11 = vld [vmem:[#allocation3 + $0x158] sm:$0xf0]  ;;  %v1395_v61 = vld [vmem:[%s4583_s0 + $0x30] sm:$0xff] }
 0x39d   :  { %v1326_v12 = vmul.f32 %v4477_v30, %v1325_v46  ;;  %2241 = vmatpush.bf16.msrb.mxu1 %v3304_v47  ;;  %2268 = vmatpush.bf16.msrb.mxu3 %v3424_v42  ;;  %v3407_v46 = vld [vmem:[#allocation3 + $0x390] sm:$0xf]  ;;  %v3208_v47 = vor.u32 %v3654_v16, %v3207_v43  ;;  %v3001_v42 = vld [vmem:[#allocation3 + $0x68] sm:$0xf0]  ;;  %v3645_v16 = vld [vmem:[#allocation3 + $0x1c4] sm:$0xf] }
 0x39e   :  { %v3408_v48 = vor.u32 %v3704_v56, %v3407_v46  ;;  %2231 = vmatpush.bf16.msrb.mxu0 %v3216_v15  ;;  %v3615_v56 = vld [vmem:[#allocation3 + $0xd4] sm:$0xf]  ;;  %v3597_v15 = vld [vmem:[#allocation3 + $0x44] sm:$0xf] }
 0x39f   :  { %v1327_v53 = vadd.f32 %v4477_v30, %v1326_v12  ;;  %v3635_v12 = vld [vmem:[#allocation3 + $0x174] sm:$0xf] }
 0x3a0   :  { %2254 = vmatpush.bf16.msrb.mxu2 %v3368_v54  ;;  %v1390_v54 = vld [vmem:[%s4583_s0 + $0x8] sm:$0xff] }
 0x3a1   :  { %v1331_v1 = vsel %vm1330_vm2, %v4477_v30, %v1327_v53  ;;  %v1389_v30 = vld [vmem:[%s4583_s0] sm:$0xff]  ;;  %2242 = vmatpush.bf16.msrb.mxu1 %v3296_v19  ;;  %2269 = vmatpush.bf16.msrb.mxu3 %v3416_v32  ;;  %v3702_v53 = vld [vmem:[#allocation3 + $0x384] sm:$0xf0]  ;;  %v4524_v13 = vpack.c.bf16 %v1390_v54, %v1390_v54 }
 0x3a2   :  { %v1336_v25 = vsel %vm1333_vm3, %v1335_v18, %v1331_v1  ;;  %v4510_v27 = vpack.c.bf16 %v1389_v30, %v1389_v30  ;;  %v3009_v18 = vld [vmem:[#allocation3 + $0x78] sm:$0xf0]  ;;  %v3400_v21 = vor.u32 %v3702_v53, %v3399_v50  ;;  %2232 = vmatpush.bf16.msrb.mxu0 %v3208_v47  ;;  %v3617_v19 = vld [vmem:[#allocation3 + $0xe4] sm:$0xf]  ;;  %v4554_v50 = vpack.c.bf16 %v1396_v57, %v1396_v57 }
 0x3a3   :  { %v4498_v28 = vmul.f32 %v1336_v25, %v4450_v10  ;;  %v4501_v23 = vmul.f32 %v1336_v25, %v4452_v39  ;;  %v3201_v1 = vld [vmem:[#allocation3 + $0x1f8] sm:$0xf0]  ;;  %v3140_v25 = vor.u32 %v3635_v12, %v3137_v26  ;;  %2194 = vmatmul.bf16.vlgmr.msra.gmra.mxu1 %v4524_v13  ;;  %v3012_v62 = vor.u32 %v3603_v31, %v3009_v18  ;;  %v2985_v26 = vld [vmem:[#allocation3 + $0x48] sm:$0xf0]  ;;  %v3613_v54 = vld [vmem:[#allocation3 + $0xc4] sm:$0xf] }
 0x3a4   :  { %2255 = vmatpush.bf16.msrb.mxu2 %v3360_v45  ;;  %2181 = vmatmul.bf16.vlgmr.msra.gmra.mxu0 %v4510_v27  ;;  %v1354_v45 = vlaneseq  ;;  %v3068_v22 = vor.u32 %v3617_v19, %v3065_v33  ;;  %v3185_v32 = vld [vmem:[#allocation3 + $0x1d8] sm:$0xf0]  ;;  %v4556_v31 = vpack.c.bf16 %v1394_v24, %v1394_v24  ;;  %v2988_v18 = vor.u32 %v3597_v15, %v2985_v26  ;;  %v3623_v33 = vld [vmem:[#allocation3 + $0x114] sm:$0xf] }
 0x3a5   :  { %v1339_v0 = vmul.f32 %v4498_v28, %v4450_v10  ;;  %v1340_v7 = vmul.f32 %v4501_v23, %v4452_v39  ;;  %v3352_v39 = vor.u32 %v3690_v44, %v3351_v20  ;;  %2243 = vmatpush.bf16.msrb.mxu1 %v3288_v59  ;;  %v1351_v51 = vrot.slane %v4501_v23, 7  ;;  %2270 = vmatpush.bf16.msrb.mxu3 %v3408_v48  ;;  %v3129_v20 = vld [vmem:[#allocation3 + $0x168] sm:$0xf0]  ;;  %v3057_v59 = vld [vmem:[#allocation3 + $0xd8] sm:$0xf0] }
 0x3a6   :  { %v3204_v44 = vor.u32 %v3651_v4, %v3201_v1  ;;  %v3076_v23 = vor.u32 %v3619_v36, %v3073_v17  ;;  %v3132_v30 = vor.u32 %v3633_v40, %v3129_v20  ;;  %vm4530_vm4 = vcmp.lt.s32.totalorder %v1354_v45, 256  ;;  %2277 = vmatpush.bf16.msra.mxu0 %v3012_v62  ;;  %v3177_v48 = vld [vmem:[#allocation3 + $0x1c8] sm:$0xf0]  ;;  %v3627_v4 = vld [vmem:[#allocation3 + $0x134] sm:$0xf] }
 0x3a7   :  { %v1341_v49 = vsel %vm1034_vm0, %v1339_v0, 0.0  ;;  %v1342_v10 = vsel %vm1034_vm0, %v1340_v7, 0.0  ;;  %v3272_v0 = vor.u32 %v3670_v38, %v3271_v37  ;;  %v3601_v7 = vld [vmem:[#allocation3 + $0x64] sm:$0xf]  ;;  %v1352_v55 = vsel %vm1034_vm0, %v4498_v28, %v1351_v51  ;;  %v3595_v37 = vld [vmem:[#allocation3 + $0x34] sm:$0xf] }
 0x3a8   :  { %v1343_v6 = vadd.f32 %v1342_v10, %v1341_v49  ;;  %2256 = vmatpush.bf16.msrb.mxu2 %v3352_v39  ;;  %v3004_v10 = vor.u32 %v3601_v7, %v3001_v42  ;;  %v3631_v39 = vld [vmem:[#allocation3 + $0x154] sm:$0xf]  ;;  %v4537_v28 = vpack.c.bf16 %v1395_v61, %v1395_v61  ;;  %1358 = vst.msk [vmem:[#allocation6] sm:$0x3] %vm4530_vm4, %v1352_v55  ;;  %v2977_v38 = vld [vmem:[#allocation3 + $0x38] sm:$0xf0] }
 0x3a9   :  { %2244 = vmatpush.bf16.msrb.mxu1 %v3280_v29  ;;  %2271 = vmatpush.bf16.msrb.mxu3 %v3400_v21  ;;  %v3124_v46 = vor.u32 %v3631_v39, %v3121_v11  ;;  %v3188_v12 = vor.u32 %v3647_v8, %v3185_v32  ;;  %v3060_v43 = vor.u32 %v3615_v56, %v3057_v59  ;;  %v3049_v29 = vld [vmem:[#allocation3 + $0xc8] sm:$0xf0]  ;;  %v3169_v47 = vld [vmem:[#allocation3 + $0x1b8] sm:$0xf0]  ;;  %v3611_v17 = vld [vmem:[#allocation3 + $0xb4] sm:$0xf] }
 0x3aa   :  { %1344 = vadd.xlane.f32.xlu1 %v1343_v6  ;;  %v3196_v6 = vor.u32 %v3649_v63, %v3193_v2  ;;  %2278 = vmatpush.bf16.msra.mxu0 %v3004_v10  ;;  %v3180_v1 = vor.u32 %v3645_v16, %v3177_v48  ;;  %v3052_v51 = vor.u32 %v3613_v54, %v3049_v29  ;;  %v3041_v45 = vld [vmem:[#allocation3 + $0xb8] sm:$0xf0]  ;;  %v3625_v62 = vld [vmem:[#allocation3 + $0x124] sm:$0xf]  ;;  %v3097_v40 = vld [vmem:[#allocation3 + $0x128] sm:$0xf0] }
 0x3ab   :  { %v2980_v21 = vor.u32 %v3595_v37, %v2977_v38  ;;  %v3044_v7 = vor.u32 %v3611_v17, %v3041_v45  ;;  %v3641_v42 = vld [vmem:[#allocation3 + $0x1a4] sm:$0xf]  ;;  %v3100_v63 = vor.u32 %v3625_v62, %v3097_v40  ;;  %v3089_v55 = vld [vmem:[#allocation3 + $0x118] sm:$0xf0]  ;;  %v3591_v10 = vld [vmem:[#allocation3 + $0x14] sm:$0xf] }
 0x3ac   :  { %2257 = vmatpush.bf16.msrb.mxu2 %v3344_v5  ;;  %v3629_v5 = vld [vmem:[#allocation3 + $0x144] sm:$0xf]  ;;  %2272 = vmatmul.bf16.vlgmr.msrb.gmra.mxu3 %v4554_v50  ;;  %v2961_v39 = vld [vmem:[#allocation3 + $0x18] sm:$0xf0]  ;;  %v3639_v61 = vld [vmem:[#allocation3 + $0x194] sm:$0xf]  ;;  %v3092_v3 = vor.u32 %v3623_v33, %v3089_v55 }
 0x3ad   :  { %2316 = vmatpush.bf16.msra.mxu3 %v3204_v44  ;;  %2245 = vmatpush.bf16.msrb.mxu1 %v3272_v0  ;;  %v3116_v53 = vor.u32 %v3629_v5, %v3113_v9  ;;  %v3593_v44 = vld [vmem:[#allocation3 + $0x24] sm:$0xf]  ;;  %v2969_v0 = vld [vmem:[#allocation3 + $0x28] sm:$0xf0]  ;;  %v3025_v8 = vld [vmem:[#allocation3 + $0x98] sm:$0xf0]  ;;  %v2964_v34 = vor.u32 %v3591_v10, %v2961_v39 }
 0x3ae   :  { %2279 = vmatpush.bf16.msra.mxu0 %v2996_v35  ;;  %v3609_v2 = vld [vmem:[#allocation3 + $0xa4] sm:$0xf]  ;;  %v2972_v19 = vor.u32 %v3593_v44, %v2969_v0  ;;  %v3081_v32 = vld [vmem:[#allocation3 + $0x108] sm:$0xf0]  ;;  %v3393_v56 = vld [vmem:[#allocation3 + $0x378] sm:$0xf0]  ;;  %v3028_v24 = vor.u32 %v3607_v14, %v3025_v8 }
 0x3af   :  { %v3589_v59 = vld [vmem:[#allocation3 + $0x4] sm:$0xf]  ;;  %v2953_v35 = vld [vmem:[#allocation3 + $0x8] sm:$0xf0]  ;;  %v3265_v15 = vld [vmem:[#allocation3 + $0x278] sm:$0xf0] }
 0x3b0   :  { %2258 = vmatpush.bf16.msrb.mxu2 %v3336_v41  ;;  %v3105_v41 = vld [vmem:[#allocation3 + $0x138] sm:$0xf0]  ;;  %v3637_v5 = vld [vmem:[#allocation3 + $0x184] sm:$0xf]  ;;  %v3145_v9 = vld [vmem:[#allocation3 + $0x188] sm:$0xf0]  ;;  %v2956_v29 = vor.u32 %v3589_v59, %v2953_v35 }
 0x3b1   :  { %2290 = vmatpush.bf16.msra.mxu1 %v3076_v23  ;;  %2317 = vmatpush.bf16.msra.mxu3 %v3196_v6  ;;  %v3108_v36 = vor.u32 %v3627_v4, %v3105_v41  ;;  %v3161_v23 = vld [vmem:[#allocation3 + $0x1a8] sm:$0xf0]  ;;  %v3153_v6 = vld [vmem:[#allocation3 + $0x198] sm:$0xf0]  ;;  %v3715_v26 = vld [vmem:[#allocation3 + $0x3f4] sm:$0xf]  ;;  %v3148_v41 = vor.u32 %v3637_v5, %v3145_v9 }
 0x3b2   :  { %2280 = vmatpush.bf16.msra.mxu0 %v2988_v18  ;;  %v3164_v49 = vor.u32 %v3641_v42, %v3161_v23  ;;  %v3156_v57 = vor.u32 %v3639_v61, %v3153_v6  ;;  %v3457_v16 = vld [vmem:[#allocation3 + $0x3f8] sm:$0xf0]  ;;  %v3605_v48 = vld [vmem:[#allocation3 + $0x84] sm:$0xf]  ;;  %v3683_v18 = vld [vmem:[#allocation3 + $0x2f4] sm:$0xf] }
 0x3b3   :  { %2259 = vmatmul.bf16.vlgmr.msrb.gmra.mxu2 %v4537_v28  ;;  %2246 = vmatmul.bf16.vlgmr.msrb.gmra.mxu1 %v4556_v31  ;;  %v3329_v4 = vld [vmem:[#allocation3 + $0x2f8] sm:$0xf0]  ;;  %v3697_v37 = vld [vmem:[#allocation3 + $0x364] sm:$0xf]  ;;  %v3385_v38 = vld [vmem:[#allocation3 + $0x368] sm:$0xf0] }
 0x3b4   :  { %2303 = vmatpush.bf16.msra.mxu2 %v3140_v25  ;;  %2233 = vmatmul.bf16.vlgmr.msrb.gmra.mxu0 %v4544_v58  ;;  %v3643_v25 = vld [vmem:[#allocation3 + $0x1b4] sm:$0xf]  ;;  %v3332_v17 = vor.u32 %v3683_v18, %v3329_v4  ;;  %v3713_v45 = vld [vmem:[#allocation3 + $0x3e4] sm:$0xf]  ;;  %v3388_v62 = vor.u32 %v3697_v37, %v3385_v38  ;;  %v3241_v14 = vld [vmem:[#allocation3 + $0x248] sm:$0xf0] }
 0x3b5   :  { %2291 = vmatpush.bf16.msra.mxu1 %v3068_v22  ;;  %2318 = vmatpush.bf16.msra.mxu3 %v3188_v12  ;;  %v3172_v20 = vor.u32 %v3643_v25, %v3169_v47  ;;  %v3621_v22 = vld [vmem:[#allocation3 + $0x104] sm:$0xf]  ;;  %v3667_v12 = vld [vmem:[#allocation3 + $0x274] sm:$0xf]  ;;  %v3433_v8 = vld [vmem:[#allocation3 + $0x3c8] sm:$0xf0] }
 0x3b6   :  { %2281 = vmatpush.bf16.msra.mxu0 %v2980_v21  ;;  %v3665_v47 = vld [vmem:[#allocation3 + $0x264] sm:$0xf]  ;;  %v3449_v21 = vld [vmem:[#allocation3 + $0x3e8] sm:$0xf0]  ;;  %v3695_v0 = vld [vmem:[#allocation3 + $0x354] sm:$0xf] }
 0x3b7   :  { %v3681_v40 = vld [vmem:[#allocation3 + $0x2e4] sm:$0xf]  ;;  %v3452_v42 = vor.u32 %v3713_v45, %v3449_v21  ;;  %v3663_v23 = vld [vmem:[#allocation3 + $0x254] sm:$0xf]  ;;  %v3417_v18 = vld [vmem:[#allocation3 + $0x3a8] sm:$0xf0] }
 0x3b8   :  { %2304 = vmatpush.bf16.msra.mxu2 %v3132_v30  ;;  %v3033_v30 = vld [vmem:[#allocation3 + $0xa8] sm:$0xf0]  ;;  %v3679_v55 = vld [vmem:[#allocation3 + $0x2d4] sm:$0xf]  ;;  %v3693_v39 = vld [vmem:[#allocation3 + $0x344] sm:$0xf] }
 0x3b9   :  { %2292 = vmatpush.bf16.msra.mxu1 %v3060_v43  ;;  %2319 = vmatpush.bf16.msra.mxu3 %v3180_v1  ;;  %v3036_v11 = vor.u32 %v3609_v2, %v3033_v30  ;;  %v3084_v43 = vor.u32 %v3621_v22, %v3081_v32  ;;  %v3268_v1 = vor.u32 %v3667_v12, %v3265_v15  ;;  %v3711_v30 = vld [vmem:[#allocation3 + $0x3d4] sm:$0xf]  ;;  %v3661_v6 = vld [vmem:[#allocation3 + $0x244] sm:$0xf]  ;;  %v3297_v12 = vld [vmem:[#allocation3 + $0x2b8] sm:$0xf0] }
 0x3ba   :  { %2282 = vmatpush.bf16.msra.mxu0 %v2972_v19  ;;  %v3441_v19 = vld [vmem:[#allocation3 + $0x3d8] sm:$0xf0]  ;;  %v3677_v32 = vld [vmem:[#allocation3 + $0x2c4] sm:$0xf]  ;;  %v3659_v59 = vld [vmem:[#allocation3 + $0x234] sm:$0xf] }
 0x3bb   :  { %v3444_v61 = vor.u32 %v3711_v30, %v3441_v19  ;;  %v3707_v5 = vld [vmem:[#allocation3 + $0x3b4] sm:$0xf]  ;;  %v3409_v21 = vld [vmem:[#allocation3 + $0x398] sm:$0xf0]  ;;  %v3701_v30 = vld [vmem:[#allocation3 + $0x384] sm:$0xf] }
 0x3bc   :  { %2305 = vmatpush.bf16.msra.mxu2 %v3124_v46  ;;  %v3699_v46 = vld [vmem:[#allocation3 + $0x374] sm:$0xf]  ;;  %v3401_v19 = vld [vmem:[#allocation3 + $0x388] sm:$0xf0]  ;;  %vm1347_vm0 = vcmask 0  }
 0x3bd   :  { %2293 = vmatpush.bf16.msra.mxu1 %v3052_v51  ;;  %2320 = vmatpush.bf16.msra.mxu3 %v3172_v20  ;;  %v3396_v54 = vor.u32 %v3699_v46, %v3393_v56  ;;  %v3460_v51 = vor.u32 %v3715_v26, %v3457_v16  ;;  %v3321_v20 = vld [vmem:[#allocation3 + $0x2e8] sm:$0xf0]  ;;  %v3691_v46 = vld [vmem:[#allocation3 + $0x334] sm:$0xf]  ;;  %v3361_v56 = vld [vmem:[#allocation3 + $0x338] sm:$0xf0] }
 0x3be   :  { %2283 = vmatpush.bf16.msra.mxu0 %v2964_v34  ;;  %v3324_v2 = vor.u32 %v3681_v40, %v3321_v20  ;;  %v3244_v34 = vor.u32 %v3661_v6, %v3241_v14  ;;  %v3364_v9 = vor.u32 %v3691_v46, %v3361_v56  ;;  %v3689_v26 = vld [vmem:[#allocation3 + $0x324] sm:$0xf]  ;;  %v3687_v38 = vld [vmem:[#allocation3 + $0x314] sm:$0xf]  ;;  %v3281_v20 = vld [vmem:[#allocation3 + $0x298] sm:$0xf0] }
 0x3bf   :  { %v3703_v45 = vld [vmem:[#allocation3 + $0x394] sm:$0xf]  ;;  %2412 = dma.vmem_to_hbm [thread:$0]  %s2408_s23, 32, %s2410_s21, [#allocation5]  }
 0x3c0   :  { %2306 = vmatpush.bf16.msra.mxu2 %v3116_v53  ;;  %v3017_v53 = vld [vmem:[#allocation3 + $0x88] sm:$0xf0]  ;;  %v3671_v40 = vld [vmem:[#allocation3 + $0x294] sm:$0xf] }
 0x3c1   :  { %2294 = vmatpush.bf16.msra.mxu1 %v3044_v7  ;;  %2321 = vmatpush.bf16.msra.mxu3 %v3164_v49  ;;  %v3020_v25 = vor.u32 %v3605_v48, %v3017_v53  ;;  %v3377_v7 = vld [vmem:[#allocation3 + $0x358] sm:$0xf0]  ;;  %v3657_v48 = vld [vmem:[#allocation3 + $0x224] sm:$0xf]  ;;  %v3225_v53 = vld [vmem:[#allocation3 + $0x228] sm:$0xf0] }
 0x3c2   :  { %2284 = vmatpush.bf16.msra.mxu0 %v2956_v29  ;;  %v3380_v33 = vor.u32 %v3695_v0, %v3377_v7  ;;  %v3313_v49 = vld [vmem:[#allocation3 + $0x2d8] sm:$0xf0]  ;;  %v3705_v29 = vld [vmem:[#allocation3 + $0x3a4] sm:$0xf]  ;;  %v3228_v37 = vor.u32 %v3657_v48, %v3225_v53  ;;  %v3337_v7 = vld [vmem:[#allocation3 + $0x308] sm:$0xf0] }
 0x3c3   :  { %v3685_v0 = vld [vmem:[#allocation3 + $0x304] sm:$0xf] }
 0x3c4   :  { %2307 = vmatpush.bf16.msra.mxu2 %v3108_v36  ;;  %v3257_v36 = vld [vmem:[#allocation3 + $0x268] sm:$0xf0] }
 0x3c5   :  { %2295 = vmatpush.bf16.msra.mxu1 %v3036_v11  ;;  %2322 = vmatpush.bf16.msra.mxu3 %v3156_v57  ;;  %v3260_v44 = vor.u32 %v3665_v47, %v3257_v36  ;;  %v3369_v11 = vld [vmem:[#allocation3 + $0x348] sm:$0xf0]  ;;  %v3233_v57 = vld [vmem:[#allocation3 + $0x238] sm:$0xf0]  ;;  %v3655_v47 = vld [vmem:[#allocation3 + $0x214] sm:$0xf] }
 0x3c6   :  { %2329 = vmatpush.bf16.msrb.mxu0 %v3268_v1  ;;  %v3372_v22 = vor.u32 %v3693_v39, %v3369_v11  ;;  %v3236_v15 = vor.u32 %v3659_v59, %v3233_v57  ;;  %v3289_v1 = vld [vmem:[#allocation3 + $0x2a8] sm:$0xf0]  ;;  %v3217_v36 = vld [vmem:[#allocation3 + $0x218] sm:$0xf0]  ;;  %v3404_v39 = vor.u32 %v3701_v30, %v3401_v19 }
 0x3c7   :  { %2285 = vmatmul.bf16.vlgmr.msra.gmra.mxu0 %v4510_v27  ;;  %v3305_v27 = vld [vmem:[#allocation3 + $0x2c8] sm:$0xf0] }
 0x3c8   :  { %2308 = vmatpush.bf16.msra.mxu2 %v3100_v63  ;;  %v3249_v63 = vld [vmem:[#allocation3 + $0x258] sm:$0xf0]  ;;  %v3308_v35 = vor.u32 %v3677_v32, %v3305_v27 }
 0x3c9   :  { %2296 = vmatpush.bf16.msra.mxu1 %v3028_v24  ;;  %2323 = vmatpush.bf16.msra.mxu3 %v3148_v41  ;;  %v3252_v10 = vor.u32 %v3663_v23, %v3249_v63  ;;  %v3675_v24 = vld [vmem:[#allocation3 + $0x2b4] sm:$0xf]  ;;  %v3673_v41 = vld [vmem:[#allocation3 + $0x2a4] sm:$0xf]  ;;  %v3209_v63 = vld [vmem:[#allocation3 + $0x208] sm:$0xf0] }
 0x3ca   :  { %2330 = vmatpush.bf16.msrb.mxu0 %v3260_v44  ;;  %v3220_v44 = vor.u32 %v3655_v47, %v3217_v36  ;;  %v3653_v23 = vld [vmem:[#allocation3 + $0x204] sm:$0xf] }
 0x3cc   :  { %2309 = vmatpush.bf16.msra.mxu2 %v3092_v3  ;;  %2324 = vmatmul.bf16.vlgmr.msra.gmra.mxu3 %v4518_v60  ;;  %v3709_v3 = vld [vmem:[#allocation3 + $0x3c4] sm:$0xf] }
 0x3cd   :  { %2368 = vmatpush.bf16.msrb.mxu3 %v3460_v51  ;;  %2297 = vmatpush.bf16.msra.mxu1 %v3020_v25  ;;  %v3436_v60 = vor.u32 %v3709_v3, %v3433_v8  ;;  %v3345_v51 = vld [vmem:[#allocation3 + $0x318] sm:$0xf0]  ;;  %v3420_v25 = vor.u32 %v3705_v29, %v3417_v18 }
 0x3ce   :  { %2331 = vmatpush.bf16.msrb.mxu0 %v3252_v10  ;;  %v3212_v10 = vor.u32 %v3653_v23, %v3209_v63 }
 0x3d0   :  { %2310 = vmatpush.bf16.msra.mxu2 %v3084_v43  ;;  %2298 = vmatmul.bf16.vlgmr.msra.gmra.mxu1 %v4524_v13  ;;  %v3425_v13 = vld [vmem:[#allocation3 + $0x3b8] sm:$0xf0]  ;;  %v3353_v43 = vld [vmem:[#allocation3 + $0x328] sm:$0xf0] }
 0x3d1   :  { %2342 = vmatpush.bf16.msrb.mxu1 %v3332_v17  ;;  %2369 = vmatpush.bf16.msrb.mxu3 %v3452_v42  ;;  %v3428_v16 = vor.u32 %v3707_v5, %v3425_v13  ;;  %v3356_v4 = vor.u32 %v3689_v26, %v3353_v43  ;;  %v3292_v17 = vor.u32 %v3673_v41, %v3289_v1 }
 0x3d2   :  { %2332 = vmatpush.bf16.msrb.mxu0 %v3244_v34  ;;  %v3412_v42 = vor.u32 %v3703_v45, %v3409_v21 }
 0x3d3   :  { %2311 = vmatmul.bf16.vlgmr.msra.gmra.mxu2 %v4485_v52  ;;  %v3316_v52 = vor.u32 %v3679_v55, %v3313_v49  ;;  %v3669_v55 = vld [vmem:[#allocation3 + $0x284] sm:$0xf]  ;;  %v3273_v49 = vld [vmem:[#allocation3 + $0x288] sm:$0xf0] }
 0x3d4   :  { %2355 = vmatpush.bf16.msrb.mxu2 %v3396_v54  ;;  %v3300_v54 = vor.u32 %v3675_v24, %v3297_v12  ;;  %v3276_v11 = vor.u32 %v3669_v55, %v3273_v49 }
 0x3d5   :  { %2343 = vmatpush.bf16.msrb.mxu1 %v3324_v2  ;;  %2370 = vmatpush.bf16.msrb.mxu3 %v3444_v61  ;;  %v3284_v2 = vor.u32 %v3671_v40, %v3281_v20  ;;  %v3817_v61 = vmov 0  }
 0x3d6   :  { %2333 = vmatpush.bf16.msrb.mxu0 %v3236_v15  ;;  %3723 = vset.pattern.permute.xlu1 %v3817_v61 }
 0x3d7   :  { %3724 = vset.pattern.permute.xlu0 %v3817_v61 }
 0x3d8   :  { %2356 = vmatpush.bf16.msrb.mxu2 %v3388_v62  ;;  %v3348_v62 = vor.u32 %v3687_v38, %v3345_v51 }
 0x3d9   :  { %2344 = vmatpush.bf16.msrb.mxu1 %v3316_v52  ;;  %2371 = vmatpush.bf16.msrb.mxu3 %v3436_v60 }
 0x3da   :  { %2334 = vmatpush.bf16.msrb.mxu0 %v3228_v37 }
 0x3dc   :  { %2357 = vmatpush.bf16.msrb.mxu2 %v3380_v33  ;;  %v3340_v33 = vor.u32 %v3685_v0, %v3337_v7 }
 0x3dd   :  { %2345 = vmatpush.bf16.msrb.mxu1 %v3308_v35  ;;  %2372 = vmatpush.bf16.msrb.mxu3 %v3428_v16 }
 0x3de   :  { %2335 = vmatpush.bf16.msrb.mxu0 %v3220_v44  ;;  %v2390_v44 = vld [vmem:[%s4585_s2] sm:$0x3] }
 0x3df   :  { %v2392_v7 = vperm.slane %v2390_v44, 0 }
 0x3e0   :  { %2358 = vmatpush.bf16.msrb.mxu2 %v3372_v22 }
 0x3e1   :  { %2346 = vmatpush.bf16.msrb.mxu1 %v3300_v54  ;;  %2373 = vmatpush.bf16.msrb.mxu3 %v3420_v25 }
 0x3e2   :  { %2336 = vmatpush.bf16.msrb.mxu0 %v3212_v10 }
 0x3e4   :  { %2359 = vmatpush.bf16.msrb.mxu2 %v3364_v9 }
 0x3e5   :  { %2347 = vmatpush.bf16.msrb.mxu1 %v3292_v17  ;;  %2374 = vmatpush.bf16.msrb.mxu3 %v3412_v42  ;;  %v2393_v42 = vperm.slane %v2390_v44, 1 }
 0x3e6   :  { %2337 = vmatmul.bf16.vlgmr.msrb.gmra.mxu0 %v4544_v58 }
 0x3e8   :  { %2360 = vmatpush.bf16.msrb.mxu2 %v3356_v4 }
 0x3e9   :  { %2348 = vmatpush.bf16.msrb.mxu1 %v3284_v2  ;;  %2375 = vmatpush.bf16.msrb.mxu3 %v3404_v39 }
 0x3ec   :  { %2361 = vmatpush.bf16.msrb.mxu2 %v3348_v62  ;;  %2376 = vmatmul.bf16.vlgmr.msrb.gmra.mxu3 %v4554_v50 }
 0x3ed   :  { %2349 = vmatpush.bf16.msrb.mxu1 %v3276_v11 }
 0x3f0   :  { %2362 = vmatpush.bf16.msrb.mxu2 %v3340_v33  ;;  %2350 = vmatmul.bf16.vlgmr.msrb.gmra.mxu1 %v4556_v31 }
 0x3f3   :  { %2363 = vmatmul.bf16.vlgmr.msrb.gmra.mxu2 %v4537_v28 }
 0x416   :  { %v2208_v14 = vpop.f32.mrf.mxu2 }
 0x41a   :  { %v2221_v32 = vpop.f32.mrf.mxu3 }
 0x41d   :  { %v1345_v6 = vpop.xlane.xlu1 %1344 }
 0x41e   :  { %3734 = vrcp.f32 %v1345_v6  ;;  %v2210_v28 = vpop.f32.mrf.mxu2 }
 0x420   :  { %v2195_v50 = vpop.f32.mrf.mxu1 }
 0x421   :  { %v2182_v3 = vpop.f32.mrf.mxu0 }
 0x422   :  { %v2196_v31 = vadd.f32 %v2195_v50, %v2182_v3  ;;  %v2223_v60 = vpop.f32.mrf.mxu3 }
 0x424   :  { %v3735_v52 = vpop.eup %3734  ;;  %v2209_v22 = vadd.f32 %v2208_v14, %v2196_v31 }
 0x425   :  { %1348 = vst.msk [vmem:[#allocation2] sm:$0x1] %vm1347_vm0, %v3735_v52 }
 0x426   :  { %v2222_v27 = vadd.f32 %v2221_v32, %v2209_v22 }
 0x428   :  { %v2197_v34 = vpop.f32.mrf.mxu1 }
 0x429   :  { %v2184_v8 = vpop.f32.mrf.mxu0 }
 0x42c   :  { %v3725_v58 = vld [vmem:[#allocation2] ss:$0 sm:$0xff] }
 0x42d   :  { %2385 = vperm.xlu1 %3723, %v3725_v58  }
 0x42f   :  { %v2273_v9 = vpop.f32.mrf.mxu3 }
 0x430   :  { %v2247_v57 = vpop.f32.mrf.mxu1 }
 0x431   :  { %v2234_v46 = vpop.f32.mrf.mxu0 }
 0x432   :  { %v2235_v56 = vadd.f32 %v2234_v46, %v2222_v27 }
 0x434   :  { %v2248_v35 = vadd.f32 %v2247_v57, %v2235_v56 }
 0x436   :  { %v2260_v59 = vpop.f32.mrf.mxu2 }
 0x437   :  { %v2261_v13 = vadd.f32 %v2260_v59, %v2248_v35  ;;  %v2275_v26 = vpop.f32.mrf.mxu3 }
 0x438   :  { %v2249_v15 = vpop.f32.mrf.mxu1 }
 0x439   :  { %v2236_v5 = vpop.f32.mrf.mxu0  ;;  %v2274_v24 = vadd.f32 %v2273_v9, %v2261_v13 }
 0x43e   :  { %v2262_v12 = vpop.f32.mrf.mxu2 }
 0x444   :  { %v2286_v43 = vpop.f32.mrf.mxu0 }
 0x44c   :  { %v2288_v54 = vpop.f32.mrf.mxu0 }
 0x44d   :  { %v2299_v16 = vpop.f32.mrf.mxu1 }
 0x44e   :  { %v2300_v17 = vadd.f32 %v2299_v16, %v2286_v43 }
 0x44f   :  { %v2325_v53 = vpop.f32.mrf.mxu3 }
 0x455   :  { %v2301_v29 = vpop.f32.mrf.mxu1 }
 0x456   :  { %v2312_v48 = vpop.f32.mrf.mxu2 }
 0x457   :  { %v2327_v4 = vpop.f32.mrf.mxu3  ;;  %v2313_v45 = vadd.f32 %v2312_v48, %v2300_v17 }
 0x459   :  { %v2326_v21 = vadd.f32 %v2325_v53, %v2313_v45 }
 0x45e   :  { %v2314_v18 = vpop.f32.mrf.mxu2 }
 0x463   :  { %v2338_v41 = vpop.f32.mrf.mxu0 }
 0x464   :  { %v2339_v62 = vadd.f32 %v2338_v41, %v2326_v21 }
 0x46b   :  { %v2340_v51 = vpop.f32.mrf.mxu0 }
 0x46d   :  { %v2351_v1 = vpop.f32.mrf.mxu1 }
 0x46e   :  { %v2352_v40 = vadd.f32 %v2351_v1, %v2339_v62 }
 0x46f   :  { %v2377_v38 = vpop.f32.mrf.mxu3 }
 0x475   :  { %v2353_v25 = vpop.f32.mrf.mxu1 }
 0x476   :  { %v2364_v37 = vpop.f32.mrf.mxu2 }
 0x477   :  { %v2379_v36 = vpop.f32.mrf.mxu3  ;;  %v2365_v20 = vadd.f32 %v2364_v37, %v2352_v40 }
 0x479   :  { %v2378_v0 = vadd.f32 %v2377_v38, %v2365_v20 }
 0x47e   :  { %v2366_v47 = vpop.f32.mrf.mxu2 }
 0x49f   :  { %v2386_v23 = vpop.permute.xlu1 %2385 }
 0x4a0   :  { %v2388_v63 = vmul.f32 %v2386_v23, %v2274_v24  ;;  %v2389_v2 = vmul.f32 %v2386_v23, %v2378_v0 }
 0x4a2   :  { %v2396_v30 = vadd.f32 %v2392_v7, %v2388_v63  ;;  %v2397_v19 = vadd.f32 %v2393_v42, %v2389_v2 }
 0x4a4   :  { %2398 = vst [vmem:[%s4587_s4] sm:$0xff] %v2396_v30 }
 0x4a5   :  { %2399 = vst [vmem:[%s4587_s4 + $0x8] sm:$0xff] %v2397_v19 }
 0x4a6   :  { %3810 = dma.done.wait [#allocation5], 32  }
 0x4a7   :  { %3811 = vsyncadd [#allocation5], 4294967264 }
 0x4a8   :  { %3812 = dma.done.wait [#allocation8], 128  }
 0x4a9   :  { %3813 = vsyncadd [#allocation8], 4294967168 }
 0x4aa   :  { %2434 = vsyncpa [#allocation4], 1 }
 0x4ab   :  { %2435 = vsyncpa [#allocation5], 1 }
 0x4ac   :  { %2436 = vsyncpa [#allocation8], 1 }

</bundles_post_ra>
